<compile_context>
chip_gen: v7x
topology: tpu7x:2x2x1
jax: 0.10.0
libtpu: 0.0.40
codegen_flags: <defaults>
</compile_context>

<pallas_src>
import jax
import jax.numpy as jnp
from jax import lax
from jax.experimental import pallas as pl
from jax.experimental.pallas import tpu as pltpu


def _same_padding(size, kernel, dilation, stride):
    return ((size - 1) * (stride - 1) + dilation * (kernel - 1)) // 2


def _round_up(x, m):
    return (x + m - 1) // m * m


def _pick_row_tile(H, W, KKC, TO, compute_bytes, out_bytes,
                   vmem_budget=8 << 20, max_rows=2048):
    """Largest divisor TH of H whose per-tile VMEM footprint fits the budget.

    Footprint counted: im2col scratch (TH*W, KKC), modulated-weight scratch
    (KKC, TO), and the double-buffered output tile (TH, W, TO).
    """
    best = 1
    for cand in range(1, H + 1):
        if H % cand:
            continue
        rows = cand * W
        if rows > max_rows:
            continue
        need = rows * KKC * compute_bytes          # im2col scratch
        need += KKC * TO * compute_bytes           # modulated-weight cache
        need += 2 * rows * TO * out_bytes          # double-buffered output tile
        if need <= vmem_budget:
            best = cand
    return best


def _make_kernel(C, TO, K, TH, W, demod, eps):
    KKC = K * K * C

    def kernel(y_ref, w_ref, x_ref, o_ref, wmod_ref, patch_ref):
        ht = pl.program_id(2)

        # --- per-(batch, O-tile) weight modulation, cached in VMEM scratch ---
        @pl.when(ht == 0)
        def _():
            y1 = y_ref[0, 0, :].astype(jnp.float32) + 1.0            # (C,)
            w = w_ref[...].astype(jnp.float32)                       # (K*K, C, TO)
            wm = (w * y1[None, :, None]).reshape(KKC, TO)            # lane-dense
            if demod:
                ssq = jnp.sum(wm * wm, axis=0, keepdims=True)        # (1, TO)
                wm = wm * lax.rsqrt(ssq + eps)                       # padded cols -> 0
            wmod_ref[...] = wm.astype(wmod_ref.dtype)

        # --- im2col for this row tile: (TH*W, K*K*C) ---
        row0 = pl.multiple_of(ht * TH, TH)
        for kh in range(K):
            for kw in range(K):
                patch = x_ref[0, pl.ds(row0 + kh, TH), pl.ds(kw, W), :]  # (TH,W,C)
                t = kh * K + kw
                patch_ref[:, t * C:(t + 1) * C] = patch.reshape(TH * W, C)

        # --- one deep matmul on the MXU (f32 accumulation) ---
        acc = jnp.dot(patch_ref[...], wmod_ref[...],
                      preferred_element_type=jnp.float32)            # (TH*W, TO)
        o_ref[0] = acc.reshape(TH, W, TO).astype(o_ref.dtype)

    return kernel


def conv2d_mod(x_nchw, y, weight, *, demod=True, stride=1, dilation=1,
               eps=1e-8, compute_dtype=jnp.bfloat16):
    """x_nchw: (B, C, H, W), y: (B, C), weight: (O, C, K, K) -> (B, O, H, W)."""
    # TODO(synk): stride/dilation != 1 not implemented in the Pallas path.
    assert stride == 1 and dilation == 1
    B, C, H, W = x_nchw.shape
    O, Cw, K, _ = weight.shape
    assert Cw == C
    # Even K would make the 'same' padding asymmetric and the halo slices OOB.
    assert K % 2 == 1, "even kernel sizes not supported"

    pad = _same_padding(H, K, dilation, stride)
    Hp, Wp = H + 2 * pad, W + 2 * pad

    out_dtype = x_nchw.dtype
    Opad = _round_up(O, 128)                 # lane-dense output / weight minor dim
    TO = 256 if Opad % 256 == 0 else 128     # O tile (divides Opad, matches MXU N)
    KKC = K * K * C
    TH = _pick_row_tile(H, W, KKC, TO,
                        compute_bytes=jnp.dtype(compute_dtype).itemsize,
                        out_bytes=jnp.dtype(out_dtype).itemsize)
    HT, OT = H // TH, Opad // TO

    # --- glue in plain JAX: layout, padding, weight pre-transpose ---
    # TODO(synk): DMA interior rows into a zero-filled VMEM halo tile instead of
    # materializing the padded activation copy in HBM.
    x_nhwc = jnp.transpose(x_nchw, (0, 2, 3, 1)).astype(compute_dtype)
    x_pad = jnp.pad(x_nhwc, ((0, 0), (pad, pad), (pad, pad), (0, 0)))

    # (O, C, K, K) -> (K, K, C, O) -> (K*K, C, Opad): per-tap slabs are lane-dense.
    w_t = jnp.transpose(weight, (2, 3, 1, 0)).reshape(K * K, C, O)
    w_t = jnp.pad(w_t, ((0, 0), (0, 0), (0, Opad - O))).astype(jnp.float32)

    y3 = y.reshape(B, 1, C).astype(jnp.float32)

    kernel = _make_kernel(C, TO, K, TH, W, demod, eps)

    cost = pl.CostEstimate(
        flops=2 * B * H * W * K * K * C * Opad,
        transcendentals=B * Opad,
        bytes_accessed=int(x_pad.size * x_pad.dtype.itemsize
                           + B * w_t.size * w_t.dtype.itemsize
                           + y3.size * 4
                           + B * H * W * Opad * jnp.dtype(out_dtype).itemsize),
    )

    out_nhwo = pl.pallas_call(
        kernel,
        out_shape=jax.ShapeDtypeStruct((B, H, W, Opad), out_dtype),
        grid_spec=pltpu.PrefetchScalarGridSpec(
            num_scalar_prefetch=0,
            grid=(B, OT, HT),
            in_specs=[
                pl.BlockSpec((1, 1, C), lambda b, ot, ht: (b, 0, 0)),          # y
                pl.BlockSpec((K * K, C, TO), lambda b, ot, ht: (0, 0, ot)),    # weight
                pl.BlockSpec((1, Hp, Wp, C), lambda b, ot, ht: (b, 0, 0, 0)),  # x (kept
                # resident across ot/ht since its block index only depends on b)
            ],
            out_specs=pl.BlockSpec((1, TH, W, TO),
                                   lambda b, ot, ht: (b, ht, 0, ot)),
            scratch_shapes=[
                pltpu.VMEM((K * K * C, TO), compute_dtype),      # modulated weight cache
                pltpu.VMEM((TH * W, K * K * C), compute_dtype),  # im2col patches
            ],
        ),
        compiler_params=pltpu.CompilerParams(
            dimension_semantics=("parallel", "parallel", "arbitrary"),
            vmem_limit_bytes=64 * 1024 * 1024,
        ),
        cost_estimate=cost,
    )(y3, w_t, x_pad)

    out = out_nhwo[..., :O]                                   # drop O padding
    return jnp.transpose(out, (0, 3, 1, 2))                   # (B, O, H, W)


def conv2d_mod_ref(x_nchw, y, weight, *, demod=True, eps=1e-8):
    """Pure-JAX reference reproducing the PyTorch forward (stride=dilation=1)."""
    B, C, H, W = x_nchw.shape
    O, _, K, _ = weight.shape
    pad = _same_padding(H, K, 1, 1)
    w1 = y[:, None, :, None, None]                      # (B,1,C,1,1)
    w2 = weight[None]                                   # (1,O,C,K,K)
    weights = w2 * (w1 + 1.0)                           # (B,O,C,K,K)
    if demod:
        d = lax.rsqrt(jnp.sum(weights ** 2, axis=(2, 3, 4), keepdims=True) + eps)
        weights = weights * d
    outs = []
    for b in range(B):
        o = lax.conv_general_dilated(
            x_nchw[b:b + 1], weights[b],
            window_strides=(1, 1),
            padding=[(pad, pad), (pad, pad)],
            dimension_numbers=("NCHW", "OIHW", "NCHW"))
        outs.append(o)
    return jnp.concatenate(outs, axis=0)


if __name__ == "__main__":
    B, C, O, K, H, W = 2, 4, 8, 3, 16, 16

    key = jax.random.PRNGKey(0)
    kx, ky, kw = jax.random.split(key, 3)

    x = jax.random.normal(kx, (B, C, H, W), dtype=jnp.float32)
    y = jax.random.normal(ky, (B, C), dtype=jnp.float32)

    # kaiming_normal_(fan_in, leaky_relu a=0): std = sqrt(2) / sqrt(C*K*K)
    fan_in = C * K * K
    std = (2.0 / fan_in) ** 0.5
    weight = std * jax.random.normal(kw, (O, C, K, K), dtype=jnp.float32)

    ref = conv2d_mod_ref(x, y, weight, demod=True)

    # f32 MXU path: strict semantics check.
    out_f32 = jax.block_until_ready(
        conv2d_mod(x, y, weight, demod=True, compute_dtype=jnp.float32))
    assert out_f32.shape == (B, O, H, W)
    assert jnp.allclose(out_f32, ref, atol=1e-3, rtol=1e-3), (
        float(jnp.max(jnp.abs(out_f32 - ref))))

    # bf16 MXU path (performance default): bf16 operands, f32 accumulation.
    out_bf16 = jax.block_until_ready(
        conv2d_mod(x, y, weight, demod=True, compute_dtype=jnp.bfloat16))
    assert out_bf16.shape == (B, O, H, W)
    assert jnp.allclose(out_bf16, ref, atol=5e-2, rtol=5e-2), (
        float(jnp.max(jnp.abs(out_bf16 - ref))))

    print("KERNEL_OK")
</pallas_src>

<mosaic_0001>
module attributes {stable_mosaic.version = 11 : i64} {
  func.func @kernel(%arg0: i32, %arg1: i32, %arg2: i32, %arg3: memref<1x1x4xf32, #tpu.memory_space<vmem>>, %arg4: memref<9x4x128xf32, #tpu.memory_space<vmem>>, %arg5: memref<1x18x18x4xf32, #tpu.memory_space<vmem>>, %arg6: memref<1x16x16x128xf32, #tpu.memory_space<vmem>>, %arg7: memref<36x128xf32, #tpu.memory_space<vmem>>, %arg8: memref<256x36xf32, #tpu.memory_space<vmem>>) attributes {dimension_semantics = [#tpu.dimension_semantics<parallel>, #tpu.dimension_semantics<parallel>, #tpu.dimension_semantics<arbitrary>], iteration_bounds = array<i64: 2, 1, 1>, scalar_prefetch = 0 : i64, scratch_operands = 2 : i64, tpu.core_type = #tpu.core_type<tc>, window_params = [{transform_indices = @transform_0, window_bounds = array<i64: 1, 1, 4>}, {transform_indices = @transform_1, window_bounds = array<i64: 9, 4, 128>}, {transform_indices = @transform_2, window_bounds = array<i64: 1, 18, 18, 4>}, {transform_indices = @transform_3, window_bounds = array<i64: 1, 16, 16, 128>}]} {
    %c0_i32 = arith.constant 0 : i32
    %0 = arith.cmpi eq, %arg2, %c0_i32 : i32
    %1 = arith.extui %0 : i1 to i32
    %c0_i32_0 = arith.constant 0 : i32
    %2 = arith.cmpi ne, %1, %c0_i32_0 : i32
    scf.if %2 {
      %c0_50 = arith.constant 0 : index
      %c0_51 = arith.constant 0 : index
      %c0_52 = arith.constant 0 : index
      %66 = vector.load %arg3[%c0_50, %c0_51, %c0_52] : memref<1x1x4xf32, #tpu.memory_space<vmem>>, vector<1x1x4xf32>
      %67 = vector.shape_cast %66 : vector<1x1x4xf32> to vector<4xf32>
      %cst_53 = arith.constant 1.000000e+00 : f32
      %68 = vector.broadcast %cst_53 : f32 to vector<4xf32>
      %69 = arith.addf %67, %68 : vector<4xf32>
      %c0_54 = arith.constant 0 : index
      %c0_55 = arith.constant 0 : index
      %c0_56 = arith.constant 0 : index
      %70 = vector.load %arg4[%c0_54, %c0_55, %c0_56] : memref<9x4x128xf32, #tpu.memory_space<vmem>>, vector<9x4x128xf32>
      %71 = vector.shape_cast %69 : vector<4xf32> to vector<1x4x1xf32>
      %72 = vector.broadcast %71 : vector<1x4x1xf32> to vector<9x4x128xf32>
      %73 = arith.mulf %70, %72 : vector<9x4x128xf32>
      %74 = vector.shape_cast %73 : vector<9x4x128xf32> to vector<36x128xf32>
      %75 = arith.mulf %74, %74 : vector<36x128xf32>
      %cst_57 = arith.constant dense<0.000000e+00> : vector<128xf32>
      %76 = vector.multi_reduction <add>, %75, %cst_57 [0] : vector<36x128xf32> to vector<128xf32>
      %77 = vector.shape_cast %76 : vector<128xf32> to vector<1x128xf32>
      %cst_58 = arith.constant 9.99999993E-9 : f32
      %78 = vector.broadcast %cst_58 : f32 to vector<1x128xf32>
      %79 = arith.addf %77, %78 : vector<1x128xf32>
      %80 = math.rsqrt %79 : vector<1x128xf32>
      %81 = vector.broadcast %80 : vector<1x128xf32> to vector<36x128xf32>
      %82 = arith.mulf %74, %81 : vector<36x128xf32>
      %c0_59 = arith.constant 0 : index
      %c0_60 = arith.constant 0 : index
      %83 = vector.load %arg7[%c0_59, %c0_60] : memref<36x128xf32, #tpu.memory_space<vmem>>, vector<36x128xf32>
      tpu.vector_store %arg7[%c0_59, %c0_60], %82 {strides = array<i32>} : memref<36x128xf32, #tpu.memory_space<vmem>>, vector<36x128xf32>,
    } else {
    }
    %c16_i32 = arith.constant 16 : i32
    %3 = arith.muli %arg2, %c16_i32 : i32
    %4 = tpu.assume_multiple %3, 16 : i32
    %c0_i32_1 = arith.constant 0 : i32
    %5 = arith.addi %4, %c0_i32_1 : i32
    %c0 = arith.constant 0 : index
    %6 = arith.index_cast %5 : i32 to index
    %c0_2 = arith.constant 0 : index
    %c0_3 = arith.constant 0 : index
    %7 = vector.load %arg5[%c0, %6, %c0_2, %c0_3] : memref<1x18x18x4xf32, #tpu.memory_space<vmem>>, vector<1x16x16x4xf32>
    %8 = vector.shape_cast %7 : vector<1x16x16x4xf32> to vector<16x16x4xf32>
    %9 = vector.shape_cast %8 : vector<16x16x4xf32> to vector<256x4xf32>
    %c0_4 = arith.constant 0 : index
    %c0_5 = arith.constant 0 : index
    %10 = vector.load %arg8[%c0_4, %c0_5] : memref<256x36xf32, #tpu.memory_space<vmem>>, vector<256x4xf32>
    tpu.vector_store %arg8[%c0_4, %c0_5], %9 {strides = array<i32>} : memref<256x36xf32, #tpu.memory_space<vmem>>, vector<256x4xf32>,
    %c0_i32_6 = arith.constant 0 : i32
    %11 = arith.addi %4, %c0_i32_6 : i32
    %c0_7 = arith.constant 0 : index
    %12 = arith.index_cast %11 : i32 to index
    %c1 = arith.constant 1 : index
    %c0_8 = arith.constant 0 : index
    %13 = vector.load %arg5[%c0_7, %12, %c1, %c0_8] : memref<1x18x18x4xf32, #tpu.memory_space<vmem>>, vector<1x16x16x4xf32>
    %14 = vector.shape_cast %13 : vector<1x16x16x4xf32> to vector<16x16x4xf32>
    %15 = vector.shape_cast %14 : vector<16x16x4xf32> to vector<256x4xf32>
    %c0_9 = arith.constant 0 : index
    %c4 = arith.constant 4 : index
    %16 = vector.load %arg8[%c0_9, %c4] : memref<256x36xf32, #tpu.memory_space<vmem>>, vector<256x4xf32>
    tpu.vector_store %arg8[%c0_9, %c4], %15 {strides = array<i32>} : memref<256x36xf32, #tpu.memory_space<vmem>>, vector<256x4xf32>,
    %c0_i32_10 = arith.constant 0 : i32
    %17 = arith.addi %4, %c0_i32_10 : i32
    %c0_11 = arith.constant 0 : index
    %18 = arith.index_cast %17 : i32 to index
    %c2 = arith.constant 2 : index
    %c0_12 = arith.constant 0 : index
    %19 = vector.load %arg5[%c0_11, %18, %c2, %c0_12] : memref<1x18x18x4xf32, #tpu.memory_space<vmem>>, vector<1x16x16x4xf32>
    %20 = vector.shape_cast %19 : vector<1x16x16x4xf32> to vector<16x16x4xf32>
    %21 = vector.shape_cast %20 : vector<16x16x4xf32> to vector<256x4xf32>
    %c0_13 = arith.constant 0 : index
    %c8 = arith.constant 8 : index
    %22 = vector.load %arg8[%c0_13, %c8] : memref<256x36xf32, #tpu.memory_space<vmem>>, vector<256x4xf32>
    tpu.vector_store %arg8[%c0_13, %c8], %21 {strides = array<i32>} : memref<256x36xf32, #tpu.memory_space<vmem>>, vector<256x4xf32>,
    %c1_i32 = arith.constant 1 : i32
    %23 = arith.addi %4, %c1_i32 : i32
    %c0_14 = arith.constant 0 : index
    %24 = arith.index_cast %23 : i32 to index
    %c0_15 = arith.constant 0 : index
    %c0_16 = arith.constant 0 : index
    %25 = vector.load %arg5[%c0_14, %24, %c0_15, %c0_16] : memref<1x18x18x4xf32, #tpu.memory_space<vmem>>, vector<1x16x16x4xf32>
    %26 = vector.shape_cast %25 : vector<1x16x16x4xf32> to vector<16x16x4xf32>
    %27 = vector.shape_cast %26 : vector<16x16x4xf32> to vector<256x4xf32>
    %c0_17 = arith.constant 0 : index
    %c12 = arith.constant 12 : index
    %28 = vector.load %arg8[%c0_17, %c12] : memref<256x36xf32, #tpu.memory_space<vmem>>, vector<256x4xf32>
    tpu.vector_store %arg8[%c0_17, %c12], %27 {strides = array<i32>} : memref<256x36xf32, #tpu.memory_space<vmem>>, vector<256x4xf32>,
    %c1_i32_18 = arith.constant 1 : i32
    %29 = arith.addi %4, %c1_i32_18 : i32
    %c0_19 = arith.constant 0 : index
    %30 = arith.index_cast %29 : i32 to index
    %c1_20 = arith.constant 1 : index
    %c0_21 = arith.constant 0 : index
    %31 = vector.load %arg5[%c0_19, %30, %c1_20, %c0_21] : memref<1x18x18x4xf32, #tpu.memory_space<vmem>>, vector<1x16x16x4xf32>
    %32 = vector.shape_cast %31 : vector<1x16x16x4xf32> to vector<16x16x4xf32>
    %33 = vector.shape_cast %32 : vector<16x16x4xf32> to vector<256x4xf32>
    %c0_22 = arith.constant 0 : index
    %c16 = arith.constant 16 : index
    %34 = vector.load %arg8[%c0_22, %c16] : memref<256x36xf32, #tpu.memory_space<vmem>>, vector<256x4xf32>
    tpu.vector_store %arg8[%c0_22, %c16], %33 {strides = array<i32>} : memref<256x36xf32, #tpu.memory_space<vmem>>, vector<256x4xf32>,
    %c1_i32_23 = arith.constant 1 : i32
    %35 = arith.addi %4, %c1_i32_23 : i32
    %c0_24 = arith.constant 0 : index
    %36 = arith.index_cast %35 : i32 to index
    %c2_25 = arith.constant 2 : index
    %c0_26 = arith.constant 0 : index
    %37 = vector.load %arg5[%c0_24, %36, %c2_25, %c0_26] : memref<1x18x18x4xf32, #tpu.memory_space<vmem>>, vector<1x16x16x4xf32>
    %38 = vector.shape_cast %37 : vector<1x16x16x4xf32> to vector<16x16x4xf32>
    %39 = vector.shape_cast %38 : vector<16x16x4xf32> to vector<256x4xf32>
    %c0_27 = arith.constant 0 : index
    %c20 = arith.constant 20 : index
    %40 = vector.load %arg8[%c0_27, %c20] : memref<256x36xf32, #tpu.memory_space<vmem>>, vector<256x4xf32>
    tpu.vector_store %arg8[%c0_27, %c20], %39 {strides = array<i32>} : memref<256x36xf32, #tpu.memory_space<vmem>>, vector<256x4xf32>,
    %c2_i32 = arith.constant 2 : i32
    %41 = arith.addi %4, %c2_i32 : i32
    %c0_28 = arith.constant 0 : index
    %42 = arith.index_cast %41 : i32 to index
    %c0_29 = arith.constant 0 : index
    %c0_30 = arith.constant 0 : index
    %43 = vector.load %arg5[%c0_28, %42, %c0_29, %c0_30] : memref<1x18x18x4xf32, #tpu.memory_space<vmem>>, vector<1x16x16x4xf32>
    %44 = vector.shape_cast %43 : vector<1x16x16x4xf32> to vector<16x16x4xf32>
    %45 = vector.shape_cast %44 : vector<16x16x4xf32> to vector<256x4xf32>
    %c0_31 = arith.constant 0 : index
    %c24 = arith.constant 24 : index
    %46 = vector.load %arg8[%c0_31, %c24] : memref<256x36xf32, #tpu.memory_space<vmem>>, vector<256x4xf32>
    tpu.vector_store %arg8[%c0_31, %c24], %45 {strides = array<i32>} : memref<256x36xf32, #tpu.memory_space<vmem>>, vector<256x4xf32>,
    %c2_i32_32 = arith.constant 2 : i32
    %47 = arith.addi %4, %c2_i32_32 : i32
    %c0_33 = arith.constant 0 : index
    %48 = arith.index_cast %47 : i32 to index
    %c1_34 = arith.constant 1 : index
    %c0_35 = arith.constant 0 : index
    %49 = vector.load %arg5[%c0_33, %48, %c1_34, %c0_35] : memref<1x18x18x4xf32, #tpu.memory_space<vmem>>, vector<1x16x16x4xf32>
    %50 = vector.shape_cast %49 : vector<1x16x16x4xf32> to vector<16x16x4xf32>
    %51 = vector.shape_cast %50 : vector<16x16x4xf32> to vector<256x4xf32>
    %c0_36 = arith.constant 0 : index
    %c28 = arith.constant 28 : index
    %52 = vector.load %arg8[%c0_36, %c28] : memref<256x36xf32, #tpu.memory_space<vmem>>, vector<256x4xf32>
    tpu.vector_store %arg8[%c0_36, %c28], %51 {strides = array<i32>} : memref<256x36xf32, #tpu.memory_space<vmem>>, vector<256x4xf32>,
    %c2_i32_37 = arith.constant 2 : i32
    %53 = arith.addi %4, %c2_i32_37 : i32
    %c0_38 = arith.constant 0 : index
    %54 = arith.index_cast %53 : i32 to index
    %c2_39 = arith.constant 2 : index
    %c0_40 = arith.constant 0 : index
    %55 = vector.load %arg5[%c0_38, %54, %c2_39, %c0_40] : memref<1x18x18x4xf32, #tpu.memory_space<vmem>>, vector<1x16x16x4xf32>
    %56 = vector.shape_cast %55 : vector<1x16x16x4xf32> to vector<16x16x4xf32>
    %57 = vector.shape_cast %56 : vector<16x16x4xf32> to vector<256x4xf32>
    %c0_41 = arith.constant 0 : index
    %c32 = arith.constant 32 : index
    %58 = vector.load %arg8[%c0_41, %c32] : memref<256x36xf32, #tpu.memory_space<vmem>>, vector<256x4xf32>
    tpu.vector_store %arg8[%c0_41, %c32], %57 {strides = array<i32>} : memref<256x36xf32, #tpu.memory_space<vmem>>, vector<256x4xf32>,
    %c0_42 = arith.constant 0 : index
    %c0_43 = arith.constant 0 : index
    %59 = vector.load %arg8[%c0_42, %c0_43] : memref<256x36xf32, #tpu.memory_space<vmem>>, vector<256x36xf32>
    %c0_44 = arith.constant 0 : index
    %c0_45 = arith.constant 0 : index
    %60 = vector.load %arg7[%c0_44, %c0_45] : memref<36x128xf32, #tpu.memory_space<vmem>>, vector<36x128xf32>
    %cst = arith.constant dense<0.000000e+00> : vector<256x128xf32>
    %61 = tpu.matmul %59, %60, %cst {dimension_numbers = #tpu.dot_dimension_numbers<[1], [0], [0], [1], [0, 0, 1, 1], [], []>} : vector<256x36xf32>, vector<36x128xf32>, vector<256x128xf32> -> vector<256x128xf32>
    %62 = vector.shape_cast %61 : vector<256x128xf32> to vector<16x16x128xf32>
    %c0_46 = arith.constant 0 : index
    %c0_47 = arith.constant 0 : index
    %c0_48 = arith.constant 0 : index
    %c0_49 = arith.constant 0 : index
    %63 = vector.load %arg6[%c0_46, %c0_47, %c0_48, %c0_49] : memref<1x16x16x128xf32, #tpu.memory_space<vmem>>, vector<1x16x16x128xf32>
    %64 = vector.shape_cast %63 : vector<1x16x16x128xf32> to vector<16x16x128xf32>
    %65 = vector.shape_cast %62 : vector<16x16x128xf32> to vector<1x16x16x128xf32>
    tpu.vector_store %arg6[%c0_46, %c0_47, %c0_48, %c0_49], %65 {strides = array<i32>} : memref<1x16x16x128xf32, #tpu.memory_space<vmem>>, vector<1x16x16x128xf32>,
    return
  }
  func.func @transform_0(%arg0: i32, %arg1: i32, %arg2: i32) -> (i32, i32, i32) {
    %c0_i32 = arith.constant 0 : i32
    %c0_i32_0 = arith.constant 0 : i32
    %c0_i32_1 = arith.constant 0 : i32
    return %arg0, %c0_i32, %c0_i32_0 : i32, i32, i32
  }
  func.func @transform_1(%arg0: i32, %arg1: i32, %arg2: i32) -> (i32, i32, i32) {
    %c0_i32 = arith.constant 0 : i32
    %c0_i32_0 = arith.constant 0 : i32
    %c0_i32_1 = arith.constant 0 : i32
    return %c0_i32, %c0_i32_0, %arg1 : i32, i32, i32
  }
  func.func @transform_2(%arg0: i32, %arg1: i32, %arg2: i32) -> (i32, i32, i32, i32) {
    %c0_i32 = arith.constant 0 : i32
    %c0_i32_0 = arith.constant 0 : i32
    %c0_i32_1 = arith.constant 0 : i32
    %c0_i32_2 = arith.constant 0 : i32
    return %arg0, %c0_i32, %c0_i32_0, %c0_i32_1 : i32, i32, i32, i32
  }
  func.func @transform_3(%arg0: i32, %arg1: i32, %arg2: i32) -> (i32, i32, i32, i32) {
    %c0_i32 = arith.constant 0 : i32
    %c0_i32_0 = arith.constant 0 : i32
    return %arg0, %arg2, %c0_i32, %arg1 : i32, i32, i32, i32
  }
}

</mosaic_0001>

<bundles_post_ra>
// kernel: tpu_custom_call.1
= control target key start
LH: loop header
LB: loop body
LE: loop exit
PB: predicated region body
PF: predicated region fallthrough
CT: control target
= control target key end

     0   :  { %s4508_s0 = inlined_call_operand.hbm [shape: f32[2,1,4], index: 0, kind: input, shape index: {}]   ;;  %s4509_s1 = inlined_call_operand.hbm [shape: f32[9,4,128], index: 1, kind: input, shape index: {}]   ;;  %s4510_s2 = inlined_call_operand.hbm [shape: f32[2,18,18,4], index: 2, kind: input, shape index: {}]   ;;  %s4511_s3 = inlined_call_operand.hbm [shape: f32[2,16,16,128], index: 3, kind: output, shape index: {}]  }
   0x1   :  { %4529 = sst [smem:[#allocation22_spill]] %s4508_s0 }
   0x2   :  { %4530 = sst [smem:[#allocation23_spill]] %s4510_s2 }
   0x3   :  { %8 = vsyncpa [#allocation5], 0 }
   0x4   :  { %10 = vsyncpa [#allocation5 + $0x1], 0 }
   0x5   :  { %11 = vsyncpa [#allocation8], 0 }
   0x6   :  { %12 = vsyncpa [#allocation6], 0 }
   0x7   :  { %14 = vsyncpa [#allocation6 + $0x1], 0  ;;  %s3190_s12 = smov 0   ;;  %s3192_s13 = smov 0  }
   0x8   :  { %s3194_s14 = smov 0   ;;  %s3196_s15 = smov 0  }
   0x9   :  { %s3198_s16 = smov 0   ;;  %s3200_s17 = smov 0  }
   0xa LB: > { %s39_s18 = sadd.s32 1, %s3147_s16  ;;  %s46_s19 = sadd.s32 1, %s3139_s14  ;;  %s3151_s17 = sphi %s3200_s17, %s20_s17   ;;  %s3147_s16 = sphi %s3198_s16, %s4564_s16   ;;  %s3143_s15 = sphi %s3196_s15, %s4563_s15   ;;  %s3139_s14 = sphi %s3194_s14, %s4562_s14   ;;  %s3135_s13 = sphi %s3192_s13, %s4561_s13   ;;  %s3131_s12 = sphi %s3190_s12, %s4560_s12  }
   0xb   : > { %p41_p0 = scmp.ge.s32.totalorder %s39_s18, 2  ;;  %p53_p1 = scmp.ne.s32.totalorder %s3139_s14, %s3135_s13 }
   0xc   : > { %p54_p2 = scmp.eq.s32.totalorder %s3151_s17, 0  ;;  %p2906_p5 = scmp.lt.s32.totalorder %s3151_s17, 2 }
   0xd   : > { %s4566_s18 = smov (%p41_p0, %s39_s18), 0  ;;  %s180_s21 = sand.u32 1, %s3151_s17  }
   0xe   : > { %p55_p4 = por %p54_p2, %p53_p1  ;;  %s43_s20 = ssub.s32 %s3147_s16, %s4566_s18 }
   0xf   : > { %p44_p6 = scmp.eq.s32.totalorder %s43_s20, 0  ;;  %s182_s22 = sand.u32 1, %s3139_s14  }
  0x10   : > { %s2532_s23 = sshll.u32 %s3147_s16, 4  ;;  %s4531_s0 = sld [smem:[#allocation22_spill]] }
  0x11   : > { %s3238_s24 = scalar_select %p44_p6, %s3139_s14, %s46_s19  }
  0x12   : > { %s183_s28 = scalar_lea.vmem [#allocation4], %s182_s22  ;;  %p3245_p7 = pnand %p2906_p5, %p55_p4 }
  0x13   : > { %s190_s29 = sshll.u32 %s183_s28, 4  ;;  %s3251_s4 = smul.u32 432, %s182_s22  ;;  %s3249_s29 = int_to_ptr.vmem [resolvable:$true] %s190_s29 }
  0x14   : > { %s2878_s5 = smul.u32 6912, %s3147_s16  ;;  %s3254_s6 = scalar_lea.sflag [#allocation5], %s180_s21 }
  0x15   : > { %p2975_p9 = pneg %p3245_p7 }
  0x16   : > { %s3243_s27 = scalar_lea.hbm %s4531_s0, %s2532_s23  ;;  %s2978_s10 = scalar_lea.hbm %s4531_s0, 32 }
  0x17   : > { %s2973_s7 = scalar_lea.hbm %s3243_s27, 16  ;;  %p2979_p12 = scmp.lt.u32.totalorder %s3243_s27, %s4531_s0 }
  0x18   : > { %p2974_p8 = scmp.ne.s32.totalorder %s3243_s27, %s2973_s7  ;;  %p2980_p13 = scmp.lt.u32.totalorder %s2978_s10, %s2973_s7 }
  0x19   : > { %p2982_p2 = scmp.lt.u32.totalorder %s2973_s7, %s3243_s27 }
  0x1a   : > { %p2976_p10 = pnand %p2975_p9, %p2974_p8  ;;  %p2981_p0 = por %p2980_p13, %p2979_p12 }
  0x1c   : > { %p2977_p11 = pneg %p2976_p10  ;;  %p2983_p4 = por %p2982_p2, %p2981_p0 }
  0x1e   : > { %p2984_p5 = pnand %p2983_p4, %p2977_p11 }
  0x20   : > { %2987 = shalt.err (!%p2984_p5)
}
  0x21   : > { %s2988_s20 = scalar_lea.vmem %s3249_s29, 16  ;;  %s3153_s21 = smov [#allocation4]  }
  0x22   : > { %p2989_p6 = scmp.ne.s32.totalorder %s3249_s29, %s2988_s20  ;;  %s2993_s22 = sshll.u32 %s3153_s21, 4  ;;  %s2994_s22 = int_to_ptr.vmem [resolvable:$false] %s2993_s22 }
  0x23   : > { %s2995_s23 = scalar_lea.vmem %s2994_s22, 32  ;;  %p2996_p3 = scmp.lt.s32.totalorder %s3249_s29, %s2994_s22 }
  0x24   : > { %p2991_p8 = pnand %p2989_p6, %p2975_p9  ;;  %p2997_p12 = scmp.lt.s32.totalorder %s2995_s23, %s2988_s20 }
  0x26   : > { %p2992_p10 = pneg %p2991_p8  ;;  %p2998_p13 = por %p2997_p12, %p2996_p3 }
  0x28   : > { %p2999_p0 = pnand %p2998_p13, %p2992_p10 }
  0x2a   : > { %3002 = shalt.err (!%p2999_p0)
}
  0x2b   : > { %2897 = dma.hbm_to_vmem [thread:$0]  (!%p3245_p7), %s3243_s27, 16, %s3249_s29, %s3254_s6  }
  0x2c   : > { %s201_s25 = scalar_lea.vmem [#allocation9], %s3251_s4  ;;  %s3286_s28 = sadd.s32 4294967295, %s3151_s17  }
  0x2d   : > { %s208_s26 = sshll.u32 %s201_s25, 4  ;;  %s2528_s7 = sadd.s32 4294967294, %s3151_s17   ;;  %s3283_s26 = int_to_ptr.vmem [resolvable:$true] %s208_s26 }
  0x2e   : > { %p59_p3 = scmp.ne.s32.totalorder %s3135_s13, %s3131_s12  ;;  %p4512_p11 = scmp.eq.s32.totalorder %s3286_s28, 0 }
  0x2f   : > { %p139_p2 = scmp.eq.s32.totalorder %s3286_s28, 1  ;;  %p145_p4 = scmp.eq.s32.totalorder %s2528_s7, 1 }
  0x30   : > { %p2529_p5 = scmp.ge.s32.totalorder %s3151_s17, 1  ;;  %p3296_p6 = por %p4512_p11, %p59_p3 }
  0x31   : > { %p3303_p8 = por %p139_p2, %p53_p1  ;;  %p3307_p10 = por %p145_p4, %p59_p3 }
  0x32   : > { %s4533_s27 = scalar_select %p3296_p6, 1, 0 }
  0x33   : > { %s4534_s29 = scalar_select %p3303_p8, 1, 0 }
  0x34   : > { %s4535_s4 = scalar_select %p3307_p10, 1, 0 }
  0x35   : > { %p152_p12 = scmp.lt.s32.totalorder %s3151_s17, 3  ;;  %s3154_s9 = smov [#allocation7]  }
  0x36   : > { %s166_s10 = sshll.u32 %s3154_s9, 4  ;;  %s4537_s2 = sld [smem:[#allocation23_spill]]  ;;  %s3316_s10 = int_to_ptr.vmem [resolvable:$true] %s166_s10 }
  0x37   : > { %p3312_p13 = pnand %p2529_p5, %p152_p12 }
  0x39   : > { %s4536_s8 = scalar_select %p3312_p13, 1, 0 }
  0x3a   : > { %p2890_p0 = pneg %p3312_p13 }
  0x3c   : > { %s3325_s20 = scalar_lea.hbm %s4537_s2, %s2878_s5  ;;  %p3329_p1 = pnand %p2890_p0, %p4512_p11 }
  0x3d   : > { %s3003_s22 = scalar_lea.hbm %s3325_s20, 6912  ;;  %s3008_s5 = scalar_lea.hbm %s4537_s2, 13824 }
  0x3e   : > { %p3004_p3 = scmp.ne.s32.totalorder %s3325_s20, %s3003_s22  ;;  %p3009_p5 = scmp.lt.u32.totalorder %s3325_s20, %s4537_s2 }
  0x3f   : > { %p3010_p12 = scmp.lt.u32.totalorder %s3008_s5, %s3003_s22  ;;  %p3012_p0 = scmp.lt.u32.totalorder %s3003_s22, %s3325_s20 }
  0x40   : > { %p3006_p2 = pnand %p3004_p3, %p2975_p9 }
  0x41   : > { %p3011_p10 = por %p3010_p12, %p3009_p5 }
  0x42   : > { %p3007_p4 = pneg %p3006_p2 }
  0x43   : > { %p3013_p11 = por %p3012_p0, %p3011_p10 }
  0x45   : > { %p3014_p8 = pnand %p3013_p11, %p3007_p4 }
  0x47   : > { %3017 = shalt.err (!%p3014_p8)
}
  0x48   : > { %s3018_s11 = scalar_lea.vmem %s3283_s26, 6912  ;;  %s3155_s19 = smov [#allocation9]  }
  0x49   : > { %p3019_p3 = scmp.ne.s32.totalorder %s3283_s26, %s3018_s11  ;;  %s3023_s23 = sshll.u32 %s3155_s19, 4  ;;  %s3024_s23 = int_to_ptr.vmem [resolvable:$false] %s3023_s23 }
  0x4a   : > { %s3025_s25 = scalar_lea.vmem %s3024_s23, 13824  ;;  %p3026_p13 = scmp.lt.s32.totalorder %s3283_s26, %s3024_s23 }
  0x4b   : > { %p3021_p2 = pnand %p3019_p3, %p2975_p9  ;;  %p3027_p5 = scmp.lt.s32.totalorder %s3025_s25, %s3018_s11 }
  0x4d   : > { %p3022_p6 = pneg %p3021_p2  ;;  %p3028_p12 = por %p3027_p5, %p3026_p13 }
  0x4f   : > { %p3029_p10 = pnand %p3028_p12, %p3022_p6 }
  0x51   : > { %3032 = shalt.err (!%p3029_p10)
}
  0x52   : > { %s3156_s22 = smov 128   ;;  %s3157_s5 = smov 8  }
  0x53   : > { %2900 = dma.hbm_to_vmem [thread:$0]  (!%p3245_p7), %s3325_s20, 6912, %s3283_s26, %s3254_s6, %s3156_s22, %s3156_s22, %s3157_s5  }
  0x54   : > { %s3033_s19 = scalar_lea.hbm %s4509_s1, 576  ;;  %p3035_p11 = pneg %p3329_p1 }
  0x55   : > { %p3034_p9 = scmp.ne.s32.totalorder %s4509_s1, %s3033_s19  ;;  %p3040_p13 = scmp.lt.u32.totalorder %s3033_s19, %s4509_s1 }
  0x57   : > { %p3036_p6 = pnand %p3035_p11, %p3034_p9 }
  0x59   : > { %p3037_p8 = pneg %p3036_p6 }
  0x5b   : > { %p3042_p4 = pnand %p3040_p13, %p3037_p8 }
  0x5d   : > { %3045 = shalt.err (!%p3042_p4)
}
  0x5e   : > { %s3046_s30 = scalar_lea.vmem %s3316_s10, 576  ;;  %p3054_p2 = scmp.lt.s32.totalorder %s3316_s10, %s3316_s10 }
  0x5f   : > { %p3047_p7 = scmp.ne.s32.totalorder %s3316_s10, %s3046_s30  ;;  %p3055_p5 = scmp.lt.s32.totalorder %s3046_s30, %s3046_s30 }
  0x61   : > { %p3049_p0 = pnand %p3047_p7, %p3035_p11  ;;  %p3056_p12 = por %p3055_p5, %p3054_p2 }
  0x63   : > { %p3050_p3 = pneg %p3049_p0 }
  0x65   : > { %p3057_p10 = pnand %p3056_p12, %p3050_p3 }
  0x67   : > { %3060 = shalt.err (!%p3057_p10)
}
  0x68   : > { %s3158_s0 = smov 64   ;;  %s3159_s2 = smov 4  }
  0x69   : > { %2893 = dma.hbm_to_vmem [thread:$0]  (!%p3329_p1), %s4509_s1, 576, %s3316_s10, [#allocation8], %s3158_s0, %s3158_s0, %s3159_s2  }
  0x6a   : > { %p4539_p9 = scmp.ne.s32.totalorder %s4536_s8, 0 }
  0x6c   : > { %220 = sbr.rel (%p4539_p9) target bundleno = 991 (0x3df), region = 32 }
  0x73   : > { %s222_s20 = sand.u32 1, %s3286_s28   ;;  %s3382_s25 = sand.u32 1, %s3135_s13  }
  0x74   : > { %s223_s22 = scalar_lea.sflag [#allocation5], %s222_s20  ;;  %s225_s5 = scalar_lea.vmem [#allocation4], %s3382_s25 }
  0x75   : > { %p4540_p11 = scmp.ne.s32.totalorder %s4533_s27, 0 }
  0x77   : > { %3114 = dma.done.wait (%p4540_p11), %s223_s22, 16  }
  0x78   : > { %3116 = vsyncadd (%p4540_p11), %s223_s22, 4294967280  ;;  %p4541_p6 = scmp.eq.s32.totalorder %s3286_s28, 0 }
  0x7a   : > { %3118 = dma.done.wait (%p4541_p6), [#allocation8], 576   ;;  %p4542_p1 = pmov %p4541_p6 }
  0x7b   : > { %s2879_s8 = smul.u32 432, %s3382_s25 }
  0x7c   : > { %3120 = vsyncadd (%p4542_p1), [#allocation8], 4294966720 }
  0x7d   : > { %s3394_s10 = scalar_lea.vmem [#allocation9], %s2879_s8 }
  0x7e   : > { %3122 = dma.done.wait (%p4540_p11), %s223_s22, 6912  }
  0x7f   : > { %3124 = vsyncadd (%p4540_p11), %s223_s22, 4294960384  ;;  %v281_v0 = vlaneseq  ;;  %v437_v1 = vld [vmem:[%s3394_s10 + $0x1] sm:$0xff]  ;;  %v438_v2 = vld [vmem:[%s3394_s10 + $0x9] sm:$0xff]  ;;  %s3160_s28 = smov 4   ;;  %vm404_vm0 = vcmask 31744   ;;  %s3161_s27 = smov 8  }
  0x80   : > { %501 = vrot.lane.b32.xlu0 %v437_v1, %s3160_s28  ;;  %503 = vrot.lane.b32.xlu1 %v438_v2, %s3160_s28  ;;  %v3405_v4 = vld [vmem:[%s3394_s10 + $0x21] sm:$0xff]  ;;  %v3408_v5 = vld [vmem:[%s3394_s10 + $0x19] sm:$0xff]  ;;  %vm597_vm1 = vcmask 64544   ;;  %s3162_s21 = smov 12   ;;  %vm325_vm2 = vcmask 1043456   ;;  %vm790_vm3 = vcmask 97344  }
  0x81   : > { %v282_v3 = vshrl.u32 %v281_v0, 7  ;;  %v270_v6 = vld [vmem:[%s225_s5] sm:$0x1]  ;;  %v3415_v9 = vld [vmem:[%s3394_s10 + $0x39] sm:$0xff]  ;;  %v443_v12 = vld [vmem:[%s3394_s10 + $0x49] sm:$0xff]  ;;  %s3163_s7 = smov 16  }
  0x82   : > { %v271_v7 = vadd.f32 1.0, %v270_v6  ;;  %v3418_v10 = vld [vmem:[%s3394_s10 + $0x31] sm:$0xff]  ;;  %v445_v14 = vld [vmem:[%s3394_s10 + $0x61] sm:$0xff]  ;;  %v446_v15 = vld [vmem:[%s3394_s10 + $0x69] sm:$0xff]  ;;  %s3164_s9 = smov 20   ;;  %s3165_s19 = smov 24  }
  0x83   : > { %v283_v8 = vsub.s32 0, %v282_v3  ;;  %v444_v13 = vld [vmem:[%s3394_s10 + $0x51] sm:$0xff]  ;;  %v447_v16 = vld [vmem:[%s3394_s10 + $0x79] sm:$0xff]  ;;  %v373_v18 = vld [vmem:[%s3394_s10 + $0x8] sm:$0xff]  ;;  %s3166_s11 = smov 28   ;;  %s3167_s23 = smov 32  }
  0x84   : > { %507 = vrot.lane.b32.xlu0 %v3405_v4, %s3160_s28  ;;  %505 = vrot.lane.b32.xlu1 %v3408_v5, %s3160_s28  ;;  %v372_v17 = vld [vmem:[%s3394_s10] sm:$0xff]  ;;  %v449_v20 = vld [vmem:[%s3394_s10 + $0x91] sm:$0xff]  ;;  %406 = vst.msk [vmem:[#allocation3 + $0x8] sm:$0xff] %vm404_vm0, %v373_v18  ;;  %vm986_vm4 = vcmask 130144   ;;  %vm1179_vm5 = vcmask 162944   ;;  %vm1372_vm6 = vcmask 195744  }
  0x85   : > { %v284_v11 = vrot.slane %v271_v7, %v283_v8  ;;  %405 = vst.msk [vmem:[#allocation3] sm:$0xff] %vm404_vm0, %v372_v17  ;;  %v448_v19 = vld [vmem:[%s3394_s10 + $0x81] sm:$0xff]  ;;  %v3446_v22 = vld [vmem:[%s3394_s10 + $0x18] sm:$0xff]  ;;  %v3456_v24 = vld [vmem:[%s3394_s10 + $0x30] sm:$0xff]  ;;  %vm1568_vm7 = vcmask 228544   ;;  %vm1761_vm8 = vcmask 261344  }
  0x86   : > { %v3441_v21 = vld [vmem:[%s3394_s10 + $0x20] sm:$0xff]  ;;  %v3449_v23 = vld [vmem:[%s3394_s10 + $0x38] sm:$0xff]  ;;  %407 = vst.msk [vmem:[#allocation3 + $0x10] sm:$0xff] %vm404_vm0, %v3446_v22  ;;  %409 = vst.msk [vmem:[#allocation3 + $0x20] sm:$0xff] %vm404_vm0, %v3456_v24  ;;  %vm1954_vm9 = vcmask 294144   ;;  %vm2024_vm10 = vcmask 293888  }
  0x87   : > { %408 = vst.msk [vmem:[#allocation3 + $0x18] sm:$0xff] %vm404_vm0, %v3441_v21  ;;  %410 = vst.msk [vmem:[#allocation3 + $0x28] sm:$0xff] %vm404_vm0, %v3449_v23  ;;  %v450_v25 = vld [vmem:[%s3394_s10 + $0x99] sm:$0xff]  ;;  %v451_v26 = vld [vmem:[%s3394_s10 + $0xa9] sm:$0xff]  ;;  %s2536_s30 = sshll.u32 %s3382_s25, 8  ;;  %s2767_s2 = sshll.u32 %s3143_s15, 12 }
  0x88   : > { %511 = vrot.lane.b32.xlu0 %v3415_v9, %s3160_s28  ;;  %509 = vrot.lane.b32.xlu1 %v3418_v10, %s3160_s28  ;;  %v3465_v27 = vld [vmem:[%s3394_s10 + $0x48] sm:$0xff]  ;;  %v3470_v28 = vld [vmem:[%s3394_s10 + $0x50] sm:$0xff]  ;;  %s4384_s0 = scalar_lea.vmem [#allocation10], %s2536_s30  ;;  %s4454_s22 = scalar_lea.hbm %s4511_s3, %s2767_s2 }
  0x89   : > { %411 = vst.msk [vmem:[#allocation3 + $0x30] sm:$0xff] %vm404_vm0, %v3465_v27  ;;  %v3473_v29 = vld [vmem:[%s3394_s10 + $0x60] sm:$0xff]  ;;  %v3476_v30 = vld [vmem:[%s3394_s10 + $0x68] sm:$0xff]  ;;  %v452_v31 = vld [vmem:[%s3394_s10 + $0xb1] sm:$0xff]  ;;  %s2400_s6 = sshll.u32 %s4384_s0, 4  ;;  %s2383_s15 = scalar_lea.sflag [#allocation6], %s3382_s25  ;;  %s4456_s6 = int_to_ptr.vmem [resolvable:$true] %s2400_s6 }
  0x8a   : > { %v453_v32 = vld [vmem:[%s3394_s10 + $0xc1] sm:$0xff]  ;;  %412 = vst.msk [vmem:[#allocation3 + $0x38] sm:$0xff] %vm404_vm0, %v3470_v28  ;;  %413 = vst.msk [vmem:[#allocation3 + $0x40] sm:$0xff] %vm404_vm0, %v3473_v29  ;;  %v3487_v33 = vld [vmem:[%s3394_s10 + $0x78] sm:$0xff]  ;;  %s3061_s5 = scalar_lea.vmem %s4456_s6, 4096  ;;  %p4557_p13 = scmp.ne.s32.totalorder %s4534_s29, 0 }
  0x8b   : > { %414 = vst.msk [vmem:[#allocation3 + $0x48] sm:$0xff] %vm404_vm0, %v3476_v30  ;;  %v3490_v34 = vld [vmem:[%s3394_s10 + $0x80] sm:$0xff]  ;;  %v3493_v35 = vld [vmem:[%s3394_s10 + $0x90] sm:$0xff]  ;;  %415 = vst.msk [vmem:[#allocation3 + $0x50] sm:$0xff] %vm404_vm0, %v3487_v33  ;;  %p3062_p8 = scmp.ne.s32.totalorder %s4456_s6, %s3061_s5  ;;  %s3168_s8 = smov [#allocation10]  }
  0x8c   : > { %286 = vbcast.lane.b32.xlu0 %v284_v11, 256  ;;  %513 = vrot.lane.b32.xlu1 %v443_v12, %s3160_s28  ;;  %416 = vst.msk [vmem:[#allocation3 + $0x58] sm:$0xff] %vm404_vm0, %v3490_v34  ;;  %417 = vst.msk [vmem:[#allocation3 + $0x60] sm:$0xff] %vm404_vm0, %v3493_v35  ;;  %v3504_v36 = vld [vmem:[%s3394_s10 + $0x98] sm:$0xff]  ;;  %v3507_v37 = vld [vmem:[%s3394_s10 + $0xa8] sm:$0xff] }
  0x8d   : > { %418 = vst.msk [vmem:[#allocation3 + $0x68] sm:$0xff] %vm404_vm0, %v3504_v36  ;;  %419 = vst.msk [vmem:[#allocation3 + $0x70] sm:$0xff] %vm404_vm0, %v3507_v37  ;;  %v3514_v38 = vld [vmem:[%s3394_s10 + $0xb0] sm:$0xff]  ;;  %v3517_v39 = vld [vmem:[%s3394_s10 + $0xc0] sm:$0xff]  ;;  %p3063_p4 = pnand %p3062_p8, %p4557_p13 }
  0x8e   : > { %v3520_v40 = vld [vmem:[%s3394_s10 + $0xc8] sm:$0xff]  ;;  %420 = vst.msk [vmem:[#allocation3 + $0x78] sm:$0xff] %vm404_vm0, %v3514_v38  ;;  %421 = vst.msk [vmem:[#allocation3 + $0x80] sm:$0xff] %vm404_vm0, %v3517_v39  ;;  %v3529_v41 = vld [vmem:[%s3394_s10 + $0xd8] sm:$0xff] }
  0x8f   : > { %422 = vst.msk [vmem:[#allocation3 + $0x88] sm:$0xff] %vm404_vm0, %v3520_v40  ;;  %v3532_v42 = vld [vmem:[%s3394_s10 + $0xe0] sm:$0xff]  ;;  %423 = vst.msk [vmem:[#allocation3 + $0x90] sm:$0xff] %vm404_vm0, %v3529_v41  ;;  %v3539_v43 = vld [vmem:[%s3394_s10 + $0xf0] sm:$0xff]  ;;  %p3064_p7 = pneg %p3063_p4 }
  0x90   : > { %515 = vrot.lane.b32.xlu0 %v444_v13, %s3160_s28  ;;  %517 = vrot.lane.b32.xlu1 %v445_v14, %s3160_s28  ;;  %424 = vst.msk [vmem:[#allocation3 + $0x98] sm:$0xff] %vm404_vm0, %v3532_v42  ;;  %v3542_v44 = vld [vmem:[%s3394_s10 + $0xf8] sm:$0xff]  ;;  %425 = vst.msk [vmem:[#allocation3 + $0xa0] sm:$0xff] %vm404_vm0, %v3539_v43  ;;  %v454_v45 = vld [vmem:[%s3394_s10 + $0xc9] sm:$0xff] }
  0x91   : > { %426 = vst.msk [vmem:[#allocation3 + $0xa8] sm:$0xff] %vm404_vm0, %v3542_v44  ;;  %v3552_v46 = vld [vmem:[%s3394_s10 + $0xd9] sm:$0xff]  ;;  %v3555_v47 = vld [vmem:[%s3394_s10 + $0x108] sm:$0xff]  ;;  %v3558_v48 = vld [vmem:[%s3394_s10 + $0x110] sm:$0xff] }
  0x92   : > { %427 = vst.msk [vmem:[#allocation3 + $0xb0] sm:$0xff] %vm404_vm0, %v3555_v47  ;;  %428 = vst.msk [vmem:[#allocation3 + $0xb8] sm:$0xff] %vm404_vm0, %v3558_v48  ;;  %v3568_v49 = vld [vmem:[%s3394_s10 + $0xe1] sm:$0xff]  ;;  %v3571_v50 = vld [vmem:[%s3394_s10 + $0xf1] sm:$0xff] }
  0x93   : > { %v3574_v51 = vld [vmem:[%s3394_s10 + $0x120] sm:$0xff]  ;;  %v3577_v52 = vld [vmem:[%s3394_s10 + $0x128] sm:$0xff]  ;;  %v3592_v55 = vld [vmem:[%s3394_s10 + $0x138] sm:$0xff] }
  0x94   : > { %519 = vrot.lane.b32.xlu0 %v446_v15, %s3160_s28  ;;  %521 = vrot.lane.b32.xlu1 %v447_v16, %s3160_s28  ;;  %429 = vst.msk [vmem:[#allocation3 + $0xc0] sm:$0xff] %vm404_vm0, %v3574_v51  ;;  %430 = vst.msk [vmem:[#allocation3 + $0xc8] sm:$0xff] %vm404_vm0, %v3577_v52  ;;  %v3588_v53 = vld [vmem:[%s3394_s10 + $0xf9] sm:$0xff]  ;;  %v459_v54 = vld [vmem:[%s3394_s10 + $0x109] sm:$0xff] }
  0x95   : > { %v3595_v56 = vld [vmem:[%s3394_s10 + $0x140] sm:$0xff]  ;;  %v460_v57 = vld [vmem:[%s3394_s10 + $0x111] sm:$0xff]  ;;  %431 = vst.msk [vmem:[#allocation3 + $0xd0] sm:$0xff] %vm404_vm0, %v3592_v55  ;;  %v3619_v61 = vld [vmem:[%s3394_s10 + $0x168] sm:$0xff] }
  0x96   : > { %432 = vst.msk [vmem:[#allocation3 + $0xd8] sm:$0xff] %vm404_vm0, %v3595_v56  ;;  %v461_v58 = vld [vmem:[%s3394_s10 + $0x121] sm:$0xff]  ;;  %v3607_v59 = vld [vmem:[%s3394_s10 + $0x150] sm:$0xff]  ;;  %v3610_v60 = vld [vmem:[%s3394_s10 + $0x158] sm:$0xff] }
  0x97   : > { %433 = vst.msk [vmem:[#allocation3 + $0xe0] sm:$0xff] %vm404_vm0, %v3607_v59  ;;  %434 = vst.msk [vmem:[#allocation3 + $0xe8] sm:$0xff] %vm404_vm0, %v3610_v60  ;;  %v3622_v62 = vld [vmem:[%s3394_s10 + $0x170] sm:$0xff]  ;;  %v463_v0 = vld [vmem:[%s3394_s10 + $0x139] sm:$0xff] }
  0x98   : > { %523 = vrot.lane.b32.xlu0 %v448_v19, %s3160_s28  ;;  %525 = vrot.lane.b32.xlu1 %v449_v20, %s3160_s28  ;;  %v462_v63 = vld [vmem:[%s3394_s10 + $0x129] sm:$0xff]  ;;  %435 = vst.msk [vmem:[#allocation3 + $0xf0] sm:$0xff] %vm404_vm0, %v3619_v61  ;;  %436 = vst.msk [vmem:[#allocation3 + $0xf8] sm:$0xff] %vm404_vm0, %v3622_v62  ;;  %v464_v1 = vld [vmem:[%s3394_s10 + $0x141] sm:$0xff] }
  0x99   : > { %v465_v2 = vld [vmem:[%s3394_s10 + $0x151] sm:$0xff]  ;;  %v466_v3 = vld [vmem:[%s3394_s10 + $0x159] sm:$0xff]  ;;  %v467_v6 = vld [vmem:[%s3394_s10 + $0x169] sm:$0xff] }
  0x9a   : > { %v468_v7 = vld [vmem:[%s3394_s10 + $0x171] sm:$0xff]  ;;  %v630_v8 = vld [vmem:[%s3394_s10 + $0x2] sm:$0xff]  ;;  %v3646_v12 = vld [vmem:[%s3394_s10 + $0x1a] sm:$0xff] }
  0x9b   : > { %v631_v11 = vld [vmem:[%s3394_s10 + $0xa] sm:$0xff]  ;;  %v3652_v13 = vld [vmem:[%s3394_s10 + $0x22] sm:$0xff]  ;;  %v3655_v14 = vld [vmem:[%s3394_s10 + $0x32] sm:$0xff] }
  0x9c   : > { %527 = vrot.lane.b32.xlu0 %v450_v25, %s3160_s28  ;;  %529 = vrot.lane.b32.xlu1 %v451_v26, %s3160_s28  ;;  %4543 = vst [vmem:[#allocation15_spill] sm:$0xff] %v3655_v14  ;;  %v3662_v15 = vld [vmem:[%s3394_s10 + $0x3a] sm:$0xff]  ;;  %v3665_v16 = vld [vmem:[%s3394_s10 + $0x4a] sm:$0xff] }
  0x9d   : > { %4544 = vst [vmem:[#allocation16_spill] sm:$0xff] %v3662_v15  ;;  %4545 = vst [vmem:[#allocation17_spill] sm:$0xff] %v3665_v16  ;;  %v637_v17 = vld [vmem:[%s3394_s10 + $0x52] sm:$0xff]  ;;  %v638_v18 = vld [vmem:[%s3394_s10 + $0x62] sm:$0xff] }
  0x9e   : > { %v639_v19 = vld [vmem:[%s3394_s10 + $0x6a] sm:$0xff]  ;;  %v640_v20 = vld [vmem:[%s3394_s10 + $0x7a] sm:$0xff]  ;;  %v641_v25 = vld [vmem:[%s3394_s10 + $0x82] sm:$0xff] }
  0x9f   : > { %v642_v26 = vld [vmem:[%s3394_s10 + $0x92] sm:$0xff] }
  0xa0   : > { %531 = vrot.lane.b32.xlu0 %v452_v31, %s3160_s28  ;;  %533 = vrot.lane.b32.xlu1 %v453_v32, %s3160_s28  ;;  %v643_v31 = vld [vmem:[%s3394_s10 + $0x9a] sm:$0xff]  ;;  %v644_v32 = vld [vmem:[%s3394_s10 + $0xaa] sm:$0xff] }
  0xa4   : > { %535 = vrot.lane.b32.xlu0 %v454_v45, %s3160_s28  ;;  %537 = vrot.lane.b32.xlu1 %v3552_v46, %s3160_s28  ;;  %v645_v45 = vld [vmem:[%s3394_s10 + $0xb2] sm:$0xff] }
  0xa8   : > { %539 = vrot.lane.b32.xlu0 %v3568_v49, %s3160_s28  ;;  %541 = vrot.lane.b32.xlu1 %v3571_v50, %s3160_s28 }
  0xac   : > { %543 = vrot.lane.b32.xlu0 %v3588_v53, %s3160_s28  ;;  %545 = vrot.lane.b32.xlu1 %v459_v54, %s3160_s28  ;;  %v646_v54 = vld [vmem:[%s3394_s10 + $0xc2] sm:$0xff] }
  0xb0   : > { %547 = vrot.lane.b32.xlu0 %v460_v57, %s3160_s28  ;;  %549 = vrot.lane.b32.xlu1 %v461_v58, %s3160_s28  ;;  %v647_v57 = vld [vmem:[%s3394_s10 + $0xca] sm:$0xff]  ;;  %v3693_v58 = vld [vmem:[%s3394_s10 + $0xda] sm:$0xff] }
  0xb4   : > { %551 = vrot.lane.b32.xlu0 %v462_v63, %s3160_s28  ;;  %553 = vrot.lane.b32.xlu1 %v463_v0, %s3160_s28  ;;  %v3699_v63 = vld [vmem:[%s3394_s10 + $0xe2] sm:$0xff]  ;;  %v3702_v0 = vld [vmem:[%s3394_s10 + $0xf2] sm:$0xff] }
  0xb5   : > { %4546 = vst [vmem:[#allocation18_spill] sm:$0xff] %v3702_v0 }
  0xb8   : > { %555 = vrot.lane.b32.xlu0 %v464_v1, %s3160_s28  ;;  %557 = vrot.lane.b32.xlu1 %v465_v2, %s3160_s28  ;;  %v3709_v1 = vld [vmem:[%s3394_s10 + $0xfa] sm:$0xff]  ;;  %v3712_v2 = vld [vmem:[%s3394_s10 + $0x10a] sm:$0xff] }
  0xb9   : > { %4547 = vst [vmem:[#allocation19_spill] sm:$0xff] %v3709_v1  ;;  %4548 = vst [vmem:[#allocation20_spill] sm:$0xff] %v3712_v2 }
  0xbc   : > { %559 = vrot.lane.b32.xlu0 %v466_v3, %s3160_s28  ;;  %561 = vrot.lane.b32.xlu1 %v467_v6, %s3160_s28  ;;  %v3719_v3 = vld [vmem:[%s3394_s10 + $0x112] sm:$0xff]  ;;  %v654_v6 = vld [vmem:[%s3394_s10 + $0x122] sm:$0xff] }
  0xbd   : > { %4549 = vst [vmem:[#allocation21_spill] sm:$0xff] %v3719_v3 }
  0xc0   : > { %563 = vrot.lane.b32.xlu0 %v468_v7, %s3160_s28  ;;  %694 = vrot.lane.b32.xlu1 %v630_v8, %s3161_s27  ;;  %v655_v7 = vld [vmem:[%s3394_s10 + $0x12a] sm:$0xff]  ;;  %v656_v8 = vld [vmem:[%s3394_s10 + $0x13a] sm:$0xff] }
  0xc4   : > { %696 = vrot.lane.b32.xlu0 %v631_v11, %s3161_s27  ;;  %698 = vrot.lane.b32.xlu1 %v3646_v12, %s3161_s27 }
  0xc8   : > { %700 = vrot.lane.b32.xlu0 %v3652_v13, %s3161_s27  ;;  %702 = vrot.lane.b32.xlu1 %v3655_v14, %s3161_s27 }
  0xcc   : > { %704 = vrot.lane.b32.xlu0 %v3662_v15, %s3161_s27  ;;  %706 = vrot.lane.b32.xlu1 %v3665_v16, %s3161_s27 }
  0xd0   : > { %708 = vrot.lane.b32.xlu0 %v637_v17, %s3161_s27  ;;  %710 = vrot.lane.b32.xlu1 %v638_v18, %s3161_s27  ;;  %v657_v18 = vld [vmem:[%s3394_s10 + $0x142] sm:$0xff] }
  0xd4   : > { %712 = vrot.lane.b32.xlu0 %v639_v19, %s3161_s27  ;;  %714 = vrot.lane.b32.xlu1 %v640_v20, %s3161_s27  ;;  %v658_v19 = vld [vmem:[%s3394_s10 + $0x152] sm:$0xff] }
  0xd8   : > { %716 = vrot.lane.b32.xlu0 %v641_v25, %s3161_s27  ;;  %718 = vrot.lane.b32.xlu1 %v642_v26, %s3161_s27  ;;  %v659_v26 = vld [vmem:[%s3394_s10 + $0x15a] sm:$0xff] }
  0xdc   : > { %720 = vrot.lane.b32.xlu0 %v643_v31, %s3161_s27  ;;  %722 = vrot.lane.b32.xlu1 %v644_v32, %s3161_s27  ;;  %v660_v31 = vld [vmem:[%s3394_s10 + $0x16a] sm:$0xff] }
  0xe0   : > { %724 = vrot.lane.b32.xlu0 %v645_v45, %s3161_s27  ;;  %726 = vrot.lane.b32.xlu1 %v646_v54, %s3161_s27  ;;  %v272_v54 = vld [vmem:[#allocation7] sm:$0xf] }
  0xe4   : > { %728 = vrot.lane.b32.xlu0 %v647_v57, %s3161_s27  ;;  %730 = vrot.lane.b32.xlu1 %v3693_v58, %s3161_s27  ;;  %v273_v57 = vld [vmem:[#allocation7 + $0x4] sm:$0xf] }
  0xe8   : > { %732 = vrot.lane.b32.xlu0 %v3699_v63, %s3161_s27  ;;  %734 = vrot.lane.b32.xlu1 %v3702_v0, %s3161_s27 }
  0xec   : > { %736 = vrot.lane.b32.xlu0 %v3709_v1, %s3161_s27  ;;  %738 = vrot.lane.b32.xlu1 %v3712_v2, %s3161_s27 }
  0xf0   : > { %740 = vrot.lane.b32.xlu0 %v3719_v3, %s3161_s27  ;;  %742 = vrot.lane.b32.xlu1 %v654_v6, %s3161_s27  ;;  %v274_v6 = vld [vmem:[#allocation7 + $0x8] sm:$0xf] }
  0xf2   : > { %v502_v11 = vpop.permute.xlu0 %501  ;;  %v504_v17 = vpop.permute.xlu1 %503 }
  0xf3   : > { %598 = vst.msk [vmem:[#allocation3] sm:$0xff] %vm597_vm1, %v502_v11  ;;  %599 = vst.msk [vmem:[#allocation3 + $0x8] sm:$0xff] %vm597_vm1, %v504_v17  ;;  %v277_v11 = vld [vmem:[#allocation7 + $0x14] sm:$0xf]  ;;  %v278_v17 = vld [vmem:[#allocation7 + $0x18] sm:$0xf] }
  0xf4   : > { %744 = vrot.lane.b32.xlu0 %v655_v7, %s3161_s27  ;;  %746 = vrot.lane.b32.xlu1 %v656_v8, %s3161_s27  ;;  %v275_v7 = vld [vmem:[#allocation7 + $0xc] sm:$0xf]  ;;  %v276_v8 = vld [vmem:[#allocation7 + $0x10] sm:$0xf] }
  0xf6   : > { %v508_v20 = vpop.permute.xlu0 %507  ;;  %v506_v25 = vpop.permute.xlu1 %505 }
  0xf7   : > { %601 = vst.msk [vmem:[#allocation3 + $0x18] sm:$0xff] %vm597_vm1, %v508_v20  ;;  %600 = vst.msk [vmem:[#allocation3 + $0x10] sm:$0xff] %vm597_vm1, %v506_v25 }
  0xf8   : > { %748 = vrot.lane.b32.xlu0 %v657_v18, %s3161_s27  ;;  %750 = vrot.lane.b32.xlu1 %v658_v19, %s3161_s27  ;;  %v279_v18 = vld [vmem:[#allocation7 + $0x1c] sm:$0xf] }
  0xf9   : > { %v661_v19 = vld [vmem:[%s3394_s10 + $0x172] sm:$0xff] }
  0xfa   : > { %v512_v32 = vpop.permute.xlu0 %511  ;;  %v510_v45 = vpop.permute.xlu1 %509 }
  0xfb   : > { %603 = vst.msk [vmem:[#allocation3 + $0x28] sm:$0xff] %vm597_vm1, %v512_v32  ;;  %602 = vst.msk [vmem:[#allocation3 + $0x20] sm:$0xff] %vm597_vm1, %v510_v45 }
  0xfc   : > { %752 = vrot.lane.b32.xlu0 %v659_v26, %s3161_s27  ;;  %754 = vrot.lane.b32.xlu1 %v660_v31, %s3161_s27  ;;  %v280_v26 = vld [vmem:[#allocation7 + $0x20] sm:$0xf] }
  0xfe   : > { %v287_v20 = vpop.permute.xlu0 %286  ;;  %v514_v25 = vpop.permute.xlu1 %513 }
  0xff   : > { %v3744_v3 = vmul.f32 %v287_v20, %v272_v54  ;;  %v3746_v32 = vmul.f32 %v287_v20, %v273_v57  ;;  %v3748_v45 = vmul.f32 %v287_v20, %v274_v6  ;;  %v3750_v2 = vmul.f32 %v287_v20, %v275_v7  ;;  %604 = vst.msk [vmem:[#allocation3 + $0x30] sm:$0xff] %vm597_vm1, %v514_v25 }
 0x100   : > { %v3753_v16 = vmul.f32 %v287_v20, %v276_v8  ;;  %v3755_v1 = vmul.f32 %v287_v20, %v277_v11  ;;  %v3757_v31 = vmul.f32 %v287_v20, %v278_v17  ;;  %v3759_v15 = vmul.f32 %v287_v20, %v279_v18  ;;  %756 = vrot.lane.b32.xlu0 %v661_v19, %s3161_s27 }
 0x101   : > { %v297_v54 = vmul.f32 %v3744_v3, %v3744_v3  ;;  %v298_v57 = vmul.f32 %v3746_v32, %v3746_v32  ;;  %v299_v6 = vmul.f32 %v3748_v45, %v3748_v45  ;;  %890 = vrot.lane.b32.xlu1 %v3446_v22, %s3162_s21  ;;  %v300_v7 = vmul.f32 %v3750_v2, %v3750_v2 }
 0x102   : > { %v301_v8 = vmul.f32 %v3753_v16, %v3753_v16  ;;  %v302_v11 = vmul.f32 %v3755_v1, %v3755_v1  ;;  %v516_v17 = vpop.permute.xlu0 %515  ;;  %v518_v18 = vpop.permute.xlu1 %517  ;;  %v3776_v19 = vmul.f32 %v287_v20, %v280_v26  ;;  %v303_v22 = vmul.f32 %v3757_v31, %v3757_v31 }
 0x103   : > { %v314_v25 = vcombine.low %v297_v54, %v298_v57  ;;  %605 = vst.msk [vmem:[#allocation3 + $0x38] sm:$0xff] %vm597_vm1, %v516_v17  ;;  %606 = vst.msk [vmem:[#allocation3 + $0x40] sm:$0xff] %vm597_vm1, %v518_v18  ;;  %v304_v0 = vmul.f32 %v3759_v15, %v3759_v15  ;;  %v315_v14 = vcombine.low %v299_v6, %v300_v7 }
 0x104   : > { %892 = vrot.lane.b32.xlu0 %v3441_v21, %s3162_s21  ;;  %v316_v20 = vcombine.low %v301_v8, %v302_v11  ;;  %v305_v17 = vmul.f32 %v3776_v19, %v3776_v19 }
 0x105   : > { %894 = vrot.lane.b32.xlu1 %v3456_v24, %s3162_s21  ;;  %v322_v26 = vadd.f32 %v315_v14, %v314_v25  ;;  %v317_v18 = vcombine.low %v303_v22, %v304_v0 }
 0x106   : > { %v520_v54 = vpop.permute.xlu0 %519  ;;  %v522_v57 = vpop.permute.xlu1 %521  ;;  %v326_v8 = vsel %vm325_vm2, %v305_v17, 0.0 }
 0x107   : > { %607 = vst.msk [vmem:[#allocation3 + $0x48] sm:$0xff] %vm597_vm1, %v520_v54  ;;  %608 = vst.msk [vmem:[#allocation3 + $0x50] sm:$0xff] %vm597_vm1, %v522_v57  ;;  %v323_v6 = vadd.f32 %v322_v26, %v316_v20 }
 0x108   : > { %896 = vrot.lane.b32.xlu0 %v3449_v23, %s3162_s21 }
 0x109   : > { %898 = vrot.lane.b32.xlu1 %v3465_v27, %s3162_s21  ;;  %v324_v21 = vadd.f32 %v323_v6, %v317_v18 }
 0x10a   : > { %v524_v14 = vpop.permute.xlu0 %523  ;;  %v526_v7 = vpop.permute.xlu1 %525 }
 0x10b   : > { %609 = vst.msk [vmem:[#allocation3 + $0x58] sm:$0xff] %vm597_vm1, %v524_v14  ;;  %610 = vst.msk [vmem:[#allocation3 + $0x60] sm:$0xff] %vm597_vm1, %v526_v7  ;;  %v327_v11 = vadd.f32 %v326_v8, %v324_v21 }
 0x10c   : > { %900 = vrot.lane.b32.xlu0 %v3470_v28, %s3162_s21 }
 0x10d   : > { %902 = vrot.lane.b32.xlu1 %v3473_v29, %s3162_s21  ;;  %v328_v0 = vrot.slane %v327_v11, 4 }
 0x10e   : > { %v528_v25 = vpop.permute.xlu0 %527  ;;  %v530_v22 = vpop.permute.xlu1 %529 }
 0x10f   : > { %611 = vst.msk [vmem:[#allocation3 + $0x68] sm:$0xff] %vm597_vm1, %v528_v25  ;;  %612 = vst.msk [vmem:[#allocation3 + $0x70] sm:$0xff] %vm597_vm1, %v530_v22  ;;  %v329_v20 = vadd.f32 %v328_v0, %v327_v11 }
 0x110   : > { %904 = vrot.lane.b32.xlu0 %v3476_v30, %s3162_s21 }
 0x111   : > { %906 = vrot.lane.b32.xlu1 %v3487_v33, %s3162_s21  ;;  %v330_v26 = vrot.slane %v329_v20, 2 }
 0x112   : > { %v532_v54 = vpop.permute.xlu0 %531  ;;  %v534_v57 = vpop.permute.xlu1 %533 }
 0x113   : > { %613 = vst.msk [vmem:[#allocation3 + $0x78] sm:$0xff] %vm597_vm1, %v532_v54  ;;  %614 = vst.msk [vmem:[#allocation3 + $0x80] sm:$0xff] %vm597_vm1, %v534_v57  ;;  %v331_v17 = vadd.f32 %v330_v26, %v329_v20 }
 0x114   : > { %908 = vrot.lane.b32.xlu0 %v3490_v34, %s3162_s21 }
 0x115   : > { %910 = vrot.lane.b32.xlu1 %v3493_v35, %s3162_s21  ;;  %v332_v18 = vrot.slane %v331_v17, 1 }
 0x116   : > { %v536_v6 = vpop.permute.xlu0 %535  ;;  %v538_v21 = vpop.permute.xlu1 %537 }
 0x117   : > { %615 = vst.msk [vmem:[#allocation3 + $0x88] sm:$0xff] %vm597_vm1, %v536_v6  ;;  %616 = vst.msk [vmem:[#allocation3 + $0x90] sm:$0xff] %vm597_vm1, %v538_v21  ;;  %v333_v14 = vadd.f32 %v332_v18, %v331_v17 }
 0x118   : > { %912 = vrot.lane.b32.xlu0 %v3504_v36, %s3162_s21 }
 0x119   : > { %914 = vrot.lane.b32.xlu1 %v3507_v37, %s3162_s21  ;;  %v334_v7 = vadd.f32 1e-08, %v333_v14 }
 0x11a   : > { %v540_v8 = vpop.permute.xlu0 %539  ;;  %v542_v11 = vpop.permute.xlu1 %541 }
 0x11b   : > { %617 = vst.msk [vmem:[#allocation3 + $0x98] sm:$0xff] %vm597_vm1, %v540_v8  ;;  %618 = vst.msk [vmem:[#allocation3 + $0xa0] sm:$0xff] %vm597_vm1, %v542_v11  ;;  %2971 = vrsqrt.f32 %v334_v7 }
 0x11c   : > { %916 = vrot.lane.b32.xlu0 %v3514_v38, %s3162_s21 }
 0x11d   : > { %918 = vrot.lane.b32.xlu1 %v3517_v39, %s3162_s21 }
 0x11e   : > { %v544_v35 = vpop.permute.xlu0 %543  ;;  %v546_v0 = vpop.permute.xlu1 %545 }
 0x11f   : > { %619 = vst.msk [vmem:[#allocation3 + $0xa8] sm:$0xff] %vm597_vm1, %v544_v35  ;;  %620 = vst.msk [vmem:[#allocation3 + $0xb0] sm:$0xff] %vm597_vm1, %v546_v0 }
 0x120   : > { %920 = vrot.lane.b32.xlu0 %v3520_v40, %s3162_s21 }
 0x121   : > { %922 = vrot.lane.b32.xlu1 %v3529_v41, %s3162_s21 }
 0x122   : > { %v548_v36 = vpop.permute.xlu0 %547  ;;  %v550_v37 = vpop.permute.xlu1 %549 }
 0x123   : > { %621 = vst.msk [vmem:[#allocation3 + $0xb8] sm:$0xff] %vm597_vm1, %v548_v36  ;;  %622 = vst.msk [vmem:[#allocation3 + $0xc0] sm:$0xff] %vm597_vm1, %v550_v37  ;;  %v2567_v36 = vld [vmem:[%s3394_s10 + $0x180] sm:$0xff]  ;;  %v2568_v37 = vld [vmem:[%s3394_s10 + $0x188] sm:$0xff] }
 0x124   : > { %924 = vrot.lane.b32.xlu0 %v3532_v42, %s3162_s21 }
 0x125   : > { %926 = vrot.lane.b32.xlu1 %v3539_v43, %s3162_s21  ;;  %v2972_v38 = vpop.eup %2971 }
 0x126   : > { %v552_v39 = vpop.permute.xlu0 %551  ;;  %v554_v25 = vpop.permute.xlu1 %553  ;;  %v337_v22 = vcombine.high %v2972_v38, %v2972_v38  ;;  %v339_v40 = vmul.f32 %v2972_v38, %v3744_v3  ;;  %v341_v41 = vmul.f32 %v2972_v38, %v3748_v45  ;;  %v343_v20 = vmul.f32 %v2972_v38, %v3753_v16 }
 0x127   : > { %623 = vst.msk [vmem:[#allocation3 + $0xc8] sm:$0xff] %vm597_vm1, %v552_v39  ;;  %624 = vst.msk [vmem:[#allocation3 + $0xd0] sm:$0xff] %vm597_vm1, %v554_v25  ;;  %v345_v26 = vmul.f32 %v2972_v38, %v3757_v31  ;;  %v347_v42 = vmul.f32 %v2972_v38, %v3776_v19 }
 0x128   : > { %928 = vrot.lane.b32.xlu0 %v3542_v44, %s3162_s21  ;;  %v340_v54 = vmul.f32 %v337_v22, %v3746_v32  ;;  %v342_v57 = vmul.f32 %v337_v22, %v3750_v2  ;;  %v344_v3 = vmul.f32 %v337_v22, %v3755_v1  ;;  %v346_v17 = vmul.f32 %v337_v22, %v3759_v15 }
 0x129   : > { %930 = vrot.lane.b32.xlu1 %v3555_v47, %s3162_s21  ;;  %368 = vst [vmem:[#allocation2 + $0x20] sm:$0xf] %v347_v42 }
 0x12a   : > { %v556_v16 = vpop.permute.xlu0 %555  ;;  %v558_v45 = vpop.permute.xlu1 %557  ;;  %v356_v31 = vcombine.low %v339_v40, %v340_v54  ;;  %v357_v18 = vcombine.low %v341_v41, %v342_v57  ;;  %v358_v19 = vcombine.low %v343_v20, %v344_v3  ;;  %v359_v6 = vcombine.low %v345_v26, %v346_v17  ;;  %v4551_v26 = vld [vmem:[#allocation18_spill] sm:$0xff]  ;;  %v4552_v3 = vld [vmem:[#allocation16_spill] sm:$0xff] }
 0x12b   : > { %625 = vst.msk [vmem:[#allocation3 + $0xd8] sm:$0xff] %vm597_vm1, %v556_v16  ;;  %626 = vst.msk [vmem:[#allocation3 + $0xe0] sm:$0xff] %vm597_vm1, %v558_v45  ;;  %v4553_v16 = vld [vmem:[#allocation19_spill] sm:$0xff] }
 0x12c   : > { %932 = vrot.lane.b32.xlu0 %v3558_v48, %s3162_s21  ;;  %v2863_v15 = vpack.c.bf16 %v357_v18, %v356_v31  ;;  %v2867_v32 = vpack.c.bf16 %v359_v6, %v358_v19 }
 0x12d   : > { %934 = vrot.lane.b32.xlu1 %v3574_v51, %s3162_s21 }
 0x12e   : > { %v560_v1 = vpop.permute.xlu0 %559  ;;  %v562_v2 = vpop.permute.xlu1 %561  ;;  %2864 = vmatprep.subr.bf16.mxu0 %v2863_v15  ;;  %2871 = vmatprep.subr.bf16.mxu1 %v2863_v15 }
 0x12f   : > { %627 = vst.msk [vmem:[#allocation3 + $0xe8] sm:$0xff] %vm597_vm1, %v560_v1  ;;  %628 = vst.msk [vmem:[#allocation3 + $0xf0] sm:$0xff] %vm597_vm1, %v562_v2  ;;  %2866 = vmatpush3.bf16.msra.mxu0 %v2863_v15  ;;  %2874 = vmatpush3.bf16.msra.mxu1 %v2863_v15  ;;  %v2667_v15 = vld [vmem:[%s3394_s10 + $0x49] sm:$0xff] }
 0x130   : > { %936 = vrot.lane.b32.xlu0 %v3577_v52, %s3162_s21  ;;  %2868 = vmatprep.subr.bf16.mxu0 %v2867_v32  ;;  %v2023_v7 = vld [vmem:[#allocation2 + $0x20] sm:$0xf] }
 0x131   : > { %938 = vrot.lane.b32.xlu1 %v3592_v55, %s3162_s21  ;;  %2872 = vmatprep.subr.bf16.mxu1 %v2867_v32 }
 0x132   : > { %v564_v21 = vpop.permute.xlu0 %563  ;;  %v695_v14 = vpop.permute.xlu1 %694 }
 0x133   : > { %629 = vst.msk [vmem:[#allocation3 + $0xf8] sm:$0xff] %vm597_vm1, %v564_v21  ;;  %2870 = vmatpush3.bf16.msra.mxu0 %v2867_v32  ;;  %2875 = vmatpush3.bf16.msra.mxu1 %v2867_v32  ;;  %v2668_v32 = vld [vmem:[%s3394_s10 + $0x51] sm:$0xff] }
 0x134   : > { %791 = vst.msk [vmem:[#allocation3] sm:$0xff] %vm790_vm3, %v695_v14  ;;  %940 = vrot.lane.b32.xlu0 %v3595_v56, %s3162_s21  ;;  %2813 = vmatprep.subr.msk.mxu0 %vm325_vm2, %v2023_v7  ;;  %v2684_v21 = vld [vmem:[%s3394_s10 + $0x111] sm:$0xff] }
 0x135   : > { %942 = vrot.lane.b32.xlu1 %v3607_v59, %s3162_s21  ;;  %2873 = vmatprep.subr.msk.mxu1 %vm325_vm2, %v2023_v7 }
 0x136   : > { %v697_v8 = vpop.permute.xlu0 %696  ;;  %v699_v11 = vpop.permute.xlu1 %698 }
 0x137   : > { %792 = vst.msk [vmem:[#allocation3 + $0x8] sm:$0xff] %vm790_vm3, %v697_v8  ;;  %793 = vst.msk [vmem:[#allocation3 + $0x10] sm:$0xff] %vm790_vm3, %v699_v11  ;;  %2814 = vmatpush3.msk.msra.mxu0 %vm325_vm2, %v2023_v7  ;;  %2876 = vmatpush3.msk.msra.mxu1 %vm325_vm2, %v2023_v7  ;;  %v4554_v8 = vld [vmem:[#allocation17_spill] sm:$0xff] }
 0x138   : > { %944 = vrot.lane.b32.xlu0 %v3610_v60, %s3162_s21 }
 0x139   : > { %946 = vrot.lane.b32.xlu1 %v3619_v61, %s3162_s21 }
 0x13a   : > { %v701_v35 = vpop.permute.xlu0 %700  ;;  %v703_v0 = vpop.permute.xlu1 %702 }
 0x13b   : > { %794 = vst.msk [vmem:[#allocation3 + $0x18] sm:$0xff] %vm790_vm3, %v701_v35  ;;  %795 = vst.msk [vmem:[#allocation3 + $0x20] sm:$0xff] %vm790_vm3, %v703_v0  ;;  %v4555_v0 = vld [vmem:[#allocation20_spill] sm:$0xff] }
 0x13c   : > { %948 = vrot.lane.b32.xlu0 %v3622_v62, %s3162_s21 }
 0x13d   : > { %950 = vrot.lane.b32.xlu1 %v2567_v36, %s3162_s21 }
 0x13e   : > { %v705_v38 = vpop.permute.xlu0 %704  ;;  %v707_v39 = vpop.permute.xlu1 %706 }
 0x13f   : > { %796 = vst.msk [vmem:[#allocation3 + $0x28] sm:$0xff] %vm790_vm3, %v705_v38  ;;  %797 = vst.msk [vmem:[#allocation3 + $0x30] sm:$0xff] %vm790_vm3, %v707_v39 }
 0x140   : > { %952 = vrot.lane.b32.xlu0 %v2568_v37, %s3162_s21  ;;  %v2605_v37 = vld [vmem:[%s3394_s10 + $0x4a] sm:$0xff] }
 0x141   : > { %1083 = vrot.lane.b32.xlu1 %v3408_v5, %s3163_s7 }
 0x142   : > { %v709_v61 = vpop.permute.xlu0 %708  ;;  %v711_v25 = vpop.permute.xlu1 %710 }
 0x143   : > { %798 = vst.msk [vmem:[#allocation3 + $0x38] sm:$0xff] %vm790_vm3, %v709_v61  ;;  %799 = vst.msk [vmem:[#allocation3 + $0x40] sm:$0xff] %vm790_vm3, %v711_v25  ;;  %v2700_v61 = vld [vmem:[%s3394_s10 + $0x52] sm:$0xff] }
 0x144   : > { %1085 = vrot.lane.b32.xlu0 %v3405_v4, %s3163_s7 }
 0x145   : > { %1087 = vrot.lane.b32.xlu1 %v3418_v10, %s3163_s7 }
 0x146   : > { %v713_v62 = vpop.permute.xlu0 %712  ;;  %v715_v22 = vpop.permute.xlu1 %714 }
 0x147   : > { %800 = vst.msk [vmem:[#allocation3 + $0x48] sm:$0xff] %vm790_vm3, %v713_v62  ;;  %801 = vst.msk [vmem:[#allocation3 + $0x50] sm:$0xff] %vm790_vm3, %v715_v22 }
 0x148   : > { %1089 = vrot.lane.b32.xlu0 %v3415_v9, %s3163_s7 }
 0x149   : > { %1115 = vrot.lane.b32.xlu1 %v3552_v46, %s3163_s7 }
 0x14a   : > { %v717_v5 = vpop.permute.xlu0 %716  ;;  %v719_v40 = vpop.permute.xlu1 %718 }
 0x14b   : > { %802 = vst.msk [vmem:[#allocation3 + $0x58] sm:$0xff] %vm790_vm3, %v717_v5  ;;  %803 = vst.msk [vmem:[#allocation3 + $0x60] sm:$0xff] %vm790_vm3, %v719_v40  ;;  %v4556_v5 = vld [vmem:[#allocation21_spill] sm:$0xff] }
 0x14c   : > { %1117 = vrot.lane.b32.xlu0 %v3568_v49, %s3163_s7 }
 0x14d   : > { %1276 = vrot.lane.b32.xlu1 %v3646_v12, %s3164_s9 }
 0x14e   : > { %v721_v4 = vpop.permute.xlu0 %720  ;;  %v723_v41 = vpop.permute.xlu1 %722 }
 0x14f   : > { %804 = vst.msk [vmem:[#allocation3 + $0x68] sm:$0xff] %vm790_vm3, %v721_v4  ;;  %805 = vst.msk [vmem:[#allocation3 + $0x70] sm:$0xff] %vm790_vm3, %v723_v41 }
 0x150   : > { %1308 = vrot.lane.b32.xlu0 %v3693_v58, %s3164_s9 }
 0x151   : > { %1278 = vrot.lane.b32.xlu1 %v3652_v13, %s3164_s9 }
 0x152   : > { %v725_v46 = vpop.permute.xlu0 %724  ;;  %v727_v20 = vpop.permute.xlu1 %726 }
 0x153   : > { %806 = vst.msk [vmem:[#allocation3 + $0x78] sm:$0xff] %vm790_vm3, %v725_v46  ;;  %807 = vst.msk [vmem:[#allocation3 + $0x80] sm:$0xff] %vm790_vm3, %v727_v20 }
 0x154   : > { %1310 = vrot.lane.b32.xlu0 %v3699_v63, %s3164_s9 }
 0x155   : > { %1472 = vrot.lane.b32.xlu1 %v3456_v24, %s3165_s19 }
 0x156   : > { %v729_v49 = vpop.permute.xlu0 %728  ;;  %v731_v12 = vpop.permute.xlu1 %730 }
 0x157   : > { %808 = vst.msk [vmem:[#allocation3 + $0x88] sm:$0xff] %vm790_vm3, %v729_v49  ;;  %809 = vst.msk [vmem:[#allocation3 + $0x90] sm:$0xff] %vm790_vm3, %v731_v12  ;;  %v2669_v49 = vld [vmem:[%s3394_s10 + $0x61] sm:$0xff] }
 0x158   : > { %1504 = vrot.lane.b32.xlu0 %v3539_v43, %s3165_s19 }
 0x159   : > { %1474 = vrot.lane.b32.xlu1 %v3449_v23, %s3165_s19 }
 0x15a   : > { %v733_v13 = vpop.permute.xlu0 %732  ;;  %v735_v58 = vpop.permute.xlu1 %734 }
 0x15b   : > { %810 = vst.msk [vmem:[#allocation3 + $0x98] sm:$0xff] %vm790_vm3, %v733_v13  ;;  %811 = vst.msk [vmem:[#allocation3 + $0xa0] sm:$0xff] %vm790_vm3, %v735_v58 }
 0x15c   : > { %1506 = vrot.lane.b32.xlu0 %v3542_v44, %s3165_s19 }
 0x15d   : > { %1665 = vrot.lane.b32.xlu1 %v3418_v10, %s3166_s11 }
 0x15e   : > { %v737_v24 = vpop.permute.xlu0 %736  ;;  %v739_v63 = vpop.permute.xlu1 %738 }
 0x15f   : > { %812 = vst.msk [vmem:[#allocation3 + $0xa8] sm:$0xff] %vm790_vm3, %v737_v24  ;;  %813 = vst.msk [vmem:[#allocation3 + $0xb0] sm:$0xff] %vm790_vm3, %v739_v63  ;;  %v2686_v24 = vld [vmem:[%s3394_s10 + $0x129] sm:$0xff] }
 0x160   : > { %1697 = vrot.lane.b32.xlu0 %v3571_v50, %s3166_s11 }
 0x161   : > { %1119 = vrot.lane.b32.xlu1 %v3571_v50, %s3163_s7  ;;  %v4550_v50 = vld [vmem:[#allocation15_spill] sm:$0xff] }
 0x162   : > { %v741_v23 = vpop.permute.xlu0 %740  ;;  %v743_v43 = vpop.permute.xlu1 %742 }
 0x163   : > { %814 = vst.msk [vmem:[#allocation3 + $0xb8] sm:$0xff] %vm790_vm3, %v741_v23  ;;  %815 = vst.msk [vmem:[#allocation3 + $0xc0] sm:$0xff] %vm790_vm3, %v743_v43  ;;  %v2701_v23 = vld [vmem:[%s3394_s10 + $0x62] sm:$0xff] }
 0x164   : > { %1667 = vrot.lane.b32.xlu0 %v3415_v9, %s3166_s11 }
 0x165   : > { %1699 = vrot.lane.b32.xlu1 %v3588_v53, %s3166_s11 }
 0x166   : > { %v745_v10 = vpop.permute.xlu0 %744  ;;  %v747_v44 = vpop.permute.xlu1 %746 }
 0x167   : > { %816 = vst.msk [vmem:[#allocation3 + $0xc8] sm:$0xff] %vm790_vm3, %v745_v10  ;;  %817 = vst.msk [vmem:[#allocation3 + $0xd0] sm:$0xff] %vm790_vm3, %v747_v44  ;;  %v2717_v10 = vld [vmem:[%s3394_s10 + $0x122] sm:$0xff] }
 0x168   : > { %1858 = vrot.lane.b32.xlu0 %v4550_v50, %s3167_s23 }
 0x169   : > { %1890 = vrot.lane.b32.xlu1 %v4551_v26, %s3167_s23 }
 0x16a   : > { %v749_v42 = vpop.permute.xlu0 %748  ;;  %v751_v54 = vpop.permute.xlu1 %750 }
 0x16b   : > { %818 = vst.msk [vmem:[#allocation3 + $0xd8] sm:$0xff] %vm790_vm3, %v749_v42  ;;  %819 = vst.msk [vmem:[#allocation3 + $0xe0] sm:$0xff] %vm790_vm3, %v751_v54 }
 0x16c   : > { %1121 = vrot.lane.b32.xlu0 %v3588_v53, %s3163_s7 }
 0x16d   : > { %1280 = vrot.lane.b32.xlu1 %v4550_v50, %s3164_s9 }
 0x16e   : > { %v753_v9 = vpop.permute.xlu0 %752  ;;  %v755_v57 = vpop.permute.xlu1 %754 }
 0x16f   : > { %820 = vst.msk [vmem:[#allocation3 + $0xe8] sm:$0xff] %vm790_vm3, %v753_v9  ;;  %821 = vst.msk [vmem:[#allocation3 + $0xf0] sm:$0xff] %vm790_vm3, %v755_v57  ;;  %v2702_v9 = vld [vmem:[%s3394_s10 + $0x6a] sm:$0xff] }
 0x170   : > { %1312 = vrot.lane.b32.xlu0 %v4551_v26, %s3164_s9 }
 0x171   : > { %1860 = vrot.lane.b32.xlu1 %v4552_v3, %s3167_s23 }
 0x172   : > { %v757_v17 = vpop.permute.xlu0 %756 }
 0x173   : > { %822 = vst.msk [vmem:[#allocation3 + $0xf8] sm:$0xff] %vm790_vm3, %v757_v17  ;;  %v891_v53 = vpop.permute.xlu1 %890 }
 0x174   : > { %1892 = vrot.lane.b32.xlu0 %v4553_v16, %s3167_s23  ;;  %987 = vst.msk [vmem:[#allocation3] sm:$0xff] %vm986_vm4, %v891_v53 }
 0x175   : > { %1282 = vrot.lane.b32.xlu1 %v4552_v3, %s3164_s9  ;;  %v2718_v3 = vld [vmem:[%s3394_s10 + $0x12a] sm:$0xff] }
 0x176   : > { %v893_v45 = vpop.permute.xlu0 %892 }
 0x177   : > { %988 = vst.msk [vmem:[#allocation3 + $0x8] sm:$0xff] %vm986_vm4, %v893_v45  ;;  %v895_v31 = vpop.permute.xlu1 %894 }
 0x178   : > { %1314 = vrot.lane.b32.xlu0 %v4553_v16, %s3164_s9  ;;  %989 = vst.msk [vmem:[#allocation3 + $0x10] sm:$0xff] %vm986_vm4, %v895_v31 }
 0x179   : > { %1476 = vrot.lane.b32.xlu1 %v3465_v27, %s3165_s19  ;;  %v2683_v27 = vld [vmem:[%s3394_s10 + $0x109] sm:$0xff] }
 0x17a   : > { %v897_v18 = vpop.permute.xlu0 %896 }
 0x17b   : > { %990 = vst.msk [vmem:[#allocation3 + $0x18] sm:$0xff] %vm986_vm4, %v897_v18  ;;  %v899_v19 = vpop.permute.xlu1 %898 }
 0x17c   : > { %1508 = vrot.lane.b32.xlu0 %v3555_v47, %s3165_s19  ;;  %991 = vst.msk [vmem:[#allocation3 + $0x20] sm:$0xff] %vm986_vm4, %v899_v19 }
 0x17d   : > { %1478 = vrot.lane.b32.xlu1 %v3470_v28, %s3165_s19 }
 0x17e   : > { %v901_v6 = vpop.permute.xlu0 %900 }
 0x17f   : > { %992 = vst.msk [vmem:[#allocation3 + $0x28] sm:$0xff] %vm986_vm4, %v901_v6  ;;  %v903_v1 = vpop.permute.xlu1 %902  ;;  %v2671_v6 = vld [vmem:[%s3394_s10 + $0x79] sm:$0xff] }
 0x180   : > { %1510 = vrot.lane.b32.xlu0 %v3558_v48, %s3165_s19  ;;  %993 = vst.msk [vmem:[#allocation3 + $0x30] sm:$0xff] %vm986_vm4, %v903_v1 }
 0x181   : > { %1669 = vrot.lane.b32.xlu1 %v2667_v15, %s3166_s11 }
 0x182   : > { %v905_v47 = vpop.permute.xlu0 %904 }
 0x183   : > { %994 = vst.msk [vmem:[#allocation3 + $0x38] sm:$0xff] %vm986_vm4, %v905_v47  ;;  %v907_v2 = vpop.permute.xlu1 %906  ;;  %v2688_v47 = vld [vmem:[%s3394_s10 + $0x141] sm:$0xff] }
 0x184   : > { %1701 = vrot.lane.b32.xlu0 %v2683_v27, %s3166_s11  ;;  %995 = vst.msk [vmem:[#allocation3 + $0x40] sm:$0xff] %vm986_vm4, %v907_v2 }
 0x185   : > { %1091 = vrot.lane.b32.xlu1 %v2667_v15, %s3163_s7 }
 0x186   : > { %v909_v28 = vpop.permute.xlu0 %908 }
 0x187   : > { %996 = vst.msk [vmem:[#allocation3 + $0x48] sm:$0xff] %vm986_vm4, %v909_v28  ;;  %v911_v48 = vpop.permute.xlu1 %910  ;;  %v2703_v28 = vld [vmem:[%s3394_s10 + $0x7a] sm:$0xff] }
 0x188   : > { %1123 = vrot.lane.b32.xlu0 %v2683_v27, %s3163_s7  ;;  %997 = vst.msk [vmem:[#allocation3 + $0x50] sm:$0xff] %vm986_vm4, %v911_v48  ;;  %v2719_v48 = vld [vmem:[%s3394_s10 + $0x13a] sm:$0xff] }
 0x189   : > { %1671 = vrot.lane.b32.xlu1 %v2668_v32, %s3166_s11 }
 0x18a   : > { %v913_v14 = vpop.permute.xlu0 %912 }
 0x18b   : > { %998 = vst.msk [vmem:[#allocation3 + $0x58] sm:$0xff] %vm986_vm4, %v913_v14  ;;  %v915_v7 = vpop.permute.xlu1 %914 }
 0x18c   : > { %1703 = vrot.lane.b32.xlu0 %v2684_v21, %s3166_s11  ;;  %999 = vst.msk [vmem:[#allocation3 + $0x60] sm:$0xff] %vm986_vm4, %v915_v7 }
 0x18d   : > { %1862 = vrot.lane.b32.xlu1 %v4554_v8, %s3167_s23 }
 0x18e   : > { %v917_v11 = vpop.permute.xlu0 %916 }
 0x18f   : > { %1000 = vst.msk [vmem:[#allocation3 + $0x68] sm:$0xff] %vm986_vm4, %v917_v11  ;;  %v919_v35 = vpop.permute.xlu1 %918 }
 0x190   : > { %1894 = vrot.lane.b32.xlu0 %v4555_v0, %s3167_s23  ;;  %1001 = vst.msk [vmem:[#allocation3 + $0x70] sm:$0xff] %vm986_vm4, %v919_v35 }
 0x191   : > { %1093 = vrot.lane.b32.xlu1 %v2668_v32, %s3163_s7 }
 0x192   : > { %v921_v36 = vpop.permute.xlu0 %920 }
 0x193   : > { %1002 = vst.msk [vmem:[#allocation3 + $0x78] sm:$0xff] %vm986_vm4, %v921_v36  ;;  %v923_v38 = vpop.permute.xlu1 %922  ;;  %v2704_v36 = vld [vmem:[%s3394_s10 + $0x82] sm:$0xff] }
 0x194   : > { %1125 = vrot.lane.b32.xlu0 %v2684_v21, %s3163_s7  ;;  %1003 = vst.msk [vmem:[#allocation3 + $0x80] sm:$0xff] %vm986_vm4, %v923_v38  ;;  %v2720_v38 = vld [vmem:[%s3394_s10 + $0x142] sm:$0xff] }
 0x195   : > { %1284 = vrot.lane.b32.xlu1 %v2605_v37, %s3164_s9 }
 0x196   : > { %v925_v39 = vpop.permute.xlu0 %924 }
 0x197   : > { %1004 = vst.msk [vmem:[#allocation3 + $0x88] sm:$0xff] %vm986_vm4, %v925_v39  ;;  %v927_v25 = vpop.permute.xlu1 %926 }
 0x198   : > { %1316 = vrot.lane.b32.xlu0 %v4555_v0, %s3164_s9  ;;  %1005 = vst.msk [vmem:[#allocation3 + $0x90] sm:$0xff] %vm986_vm4, %v927_v25 }
 0x199   : > { %1864 = vrot.lane.b32.xlu1 %v2700_v61, %s3167_s23 }
 0x19a   : > { %v929_v62 = vpop.permute.xlu0 %928 }
 0x19b   : > { %1006 = vst.msk [vmem:[#allocation3 + $0x98] sm:$0xff] %vm986_vm4, %v929_v62  ;;  %v931_v22 = vpop.permute.xlu1 %930 }
 0x19c   : > { %1896 = vrot.lane.b32.xlu0 %v4556_v5, %s3167_s23  ;;  %1007 = vst.msk [vmem:[#allocation3 + $0xa0] sm:$0xff] %vm986_vm4, %v931_v22 }
 0x19d   : > { %1286 = vrot.lane.b32.xlu1 %v2700_v61, %s3164_s9 }
 0x19e   : > { %v933_v40 = vpop.permute.xlu0 %932 }
 0x19f   : > { %1008 = vst.msk [vmem:[#allocation3 + $0xa8] sm:$0xff] %vm986_vm4, %v933_v40  ;;  %v935_v4 = vpop.permute.xlu1 %934 }
 0x1a0   : > { %1318 = vrot.lane.b32.xlu0 %v4556_v5, %s3164_s9  ;;  %1009 = vst.msk [vmem:[#allocation3 + $0xb0] sm:$0xff] %vm986_vm4, %v935_v4  ;;  %v2641_v5 = vld [vmem:[%s3394_s10 + $0x90] sm:$0xff] }
 0x1a1   : > { %1480 = vrot.lane.b32.xlu1 %v3473_v29, %s3165_s19  ;;  %v2685_v29 = vld [vmem:[%s3394_s10 + $0x121] sm:$0xff] }
 0x1a2   : > { %v937_v41 = vpop.permute.xlu0 %936 }
 0x1a3   : > { %1010 = vst.msk [vmem:[#allocation3 + $0xb8] sm:$0xff] %vm986_vm4, %v937_v41  ;;  %v939_v46 = vpop.permute.xlu1 %938  ;;  %v2642_v41 = vld [vmem:[%s3394_s10 + $0x98] sm:$0xff] }
 0x1a4   : > { %1512 = vrot.lane.b32.xlu0 %v3574_v51, %s3165_s19  ;;  %1011 = vst.msk [vmem:[#allocation3 + $0xc0] sm:$0xff] %vm986_vm4, %v939_v46 }
 0x1a5   : > { %1482 = vrot.lane.b32.xlu1 %v3476_v30, %s3165_s19 }
 0x1a6   : > { %v941_v20 = vpop.permute.xlu0 %940 }
 0x1a7   : > { %1012 = vst.msk [vmem:[#allocation3 + $0xc8] sm:$0xff] %vm986_vm4, %v941_v20  ;;  %v943_v12 = vpop.permute.xlu1 %942 }
 0x1a8   : > { %1514 = vrot.lane.b32.xlu0 %v3577_v52, %s3165_s19  ;;  %1013 = vst.msk [vmem:[#allocation3 + $0xd0] sm:$0xff] %vm986_vm4, %v943_v12  ;;  %v2670_v52 = vld [vmem:[%s3394_s10 + $0x69] sm:$0xff] }
 0x1a9   : > { %1673 = vrot.lane.b32.xlu1 %v2669_v49, %s3166_s11 }
 0x1aa   : > { %v945_v51 = vpop.permute.xlu0 %944 }
 0x1ab   : > { %1014 = vst.msk [vmem:[#allocation3 + $0xd8] sm:$0xff] %vm986_vm4, %v945_v51  ;;  %v947_v30 = vpop.permute.xlu1 %946 }
 0x1ac   : > { %1705 = vrot.lane.b32.xlu0 %v2685_v29, %s3166_s11  ;;  %1015 = vst.msk [vmem:[#allocation3 + $0xe0] sm:$0xff] %vm986_vm4, %v947_v30 }
 0x1ad   : > { %1095 = vrot.lane.b32.xlu1 %v2669_v49, %s3163_s7  ;;  %v2673_v49 = vld [vmem:[%s3394_s10 + $0x91] sm:$0xff] }
 0x1ae   : > { %v949_v13 = vpop.permute.xlu0 %948 }
 0x1af   : > { %1016 = vst.msk [vmem:[#allocation3 + $0xe8] sm:$0xff] %vm986_vm4, %v949_v13  ;;  %v951_v58 = vpop.permute.xlu1 %950 }
 0x1b0   : > { %1127 = vrot.lane.b32.xlu0 %v2685_v29, %s3163_s7  ;;  %1017 = vst.msk [vmem:[#allocation3 + $0xf0] sm:$0xff] %vm986_vm4, %v951_v58  ;;  %v2689_v29 = vld [vmem:[%s3394_s10 + $0x151] sm:$0xff] }
 0x1b1   : > { %1675 = vrot.lane.b32.xlu1 %v2670_v52, %s3166_s11 }
 0x1b2   : > { %v953_v63 = vpop.permute.xlu0 %952 }
 0x1b3   : > { %1018 = vst.msk [vmem:[#allocation3 + $0xf8] sm:$0xff] %vm986_vm4, %v953_v63  ;;  %v1084_v43 = vpop.permute.xlu1 %1083 }
 0x1b4   : > { %1707 = vrot.lane.b32.xlu0 %v2686_v24, %s3166_s11  ;;  %1180 = vst.msk [vmem:[#allocation3] sm:$0xff] %vm1179_vm5, %v1084_v43 }
 0x1b5   : > { %1866 = vrot.lane.b32.xlu1 %v2701_v23, %s3167_s23 }
 0x1b6   : > { %v1086_v44 = vpop.permute.xlu0 %1085 }
 0x1b7   : > { %1181 = vst.msk [vmem:[#allocation3 + $0x8] sm:$0xff] %vm1179_vm5, %v1086_v44  ;;  %v1088_v50 = vpop.permute.xlu1 %1087 }
 0x1b8   : > { %1898 = vrot.lane.b32.xlu0 %v2717_v10, %s3167_s23  ;;  %1182 = vst.msk [vmem:[#allocation3 + $0x10] sm:$0xff] %vm1179_vm5, %v1088_v50 }
 0x1b9   : > { %1097 = vrot.lane.b32.xlu1 %v2670_v52, %s3163_s7  ;;  %v2690_v52 = vld [vmem:[%s3394_s10 + $0x159] sm:$0xff] }
 0x1ba   : > { %v1090_v26 = vpop.permute.xlu0 %1089 }
 0x1bb   : > { %1183 = vst.msk [vmem:[#allocation3 + $0x18] sm:$0xff] %vm1179_vm5, %v1090_v26  ;;  %v1116_v42 = vpop.permute.xlu1 %1115 }
 0x1bc   : > { %1129 = vrot.lane.b32.xlu0 %v2686_v24, %s3163_s7  ;;  %1196 = vst.msk [vmem:[#allocation3 + $0x80] sm:$0xff] %vm1179_vm5, %v1116_v42  ;;  %v2705_v24 = vld [vmem:[%s3394_s10 + $0x92] sm:$0xff] }
 0x1bd   : > { %1288 = vrot.lane.b32.xlu1 %v2701_v23, %s3164_s9  ;;  %v2721_v23 = vld [vmem:[%s3394_s10 + $0x152] sm:$0xff] }
 0x1be   : > { %v1118_v54 = vpop.permute.xlu0 %1117 }
 0x1bf   : > { %1197 = vst.msk [vmem:[#allocation3 + $0x88] sm:$0xff] %vm1179_vm5, %v1118_v54  ;;  %v1277_v57 = vpop.permute.xlu1 %1276 }
 0x1c0   : > { %1320 = vrot.lane.b32.xlu0 %v2717_v10, %s3164_s9  ;;  %1373 = vst.msk [vmem:[#allocation3] sm:$0xff] %vm1372_vm6, %v1277_v57 }
 0x1c1   : > { %1868 = vrot.lane.b32.xlu1 %v2702_v9, %s3167_s23 }
 0x1c2   : > { %v1309_v17 = vpop.permute.xlu0 %1308 }
 0x1c3   : > { %1389 = vst.msk [vmem:[#allocation3 + $0x80] sm:$0xff] %vm1372_vm6, %v1309_v17  ;;  %v1279_v53 = vpop.permute.xlu1 %1278 }
 0x1c4   : > { %1900 = vrot.lane.b32.xlu0 %v2718_v3, %s3167_s23  ;;  %1374 = vst.msk [vmem:[#allocation3 + $0x8] sm:$0xff] %vm1372_vm6, %v1279_v53 }
 0x1c5   : > { %1290 = vrot.lane.b32.xlu1 %v2702_v9, %s3164_s9  ;;  %v2706_v9 = vld [vmem:[%s3394_s10 + $0x9a] sm:$0xff] }
 0x1c6   : > { %v1311_v16 = vpop.permute.xlu0 %1310 }
 0x1c7   : > { %1390 = vst.msk [vmem:[#allocation3 + $0x88] sm:$0xff] %vm1372_vm6, %v1311_v16  ;;  %v1473_v45 = vpop.permute.xlu1 %1472 }
 0x1c8   : > { %1322 = vrot.lane.b32.xlu0 %v2718_v3, %s3164_s9  ;;  %1569 = vst.msk [vmem:[#allocation3] sm:$0xff] %vm1568_vm7, %v1473_v45  ;;  %v2722_v3 = vld [vmem:[%s3394_s10 + $0x15a] sm:$0xff] }
 0x1c9   : > { %1484 = vrot.lane.b32.xlu1 %v3487_v33, %s3165_s19  ;;  %v2687_v33 = vld [vmem:[%s3394_s10 + $0x139] sm:$0xff] }
 0x1ca   : > { %v1505_v31 = vpop.permute.xlu0 %1504 }
 0x1cb   : > { %1585 = vst.msk [vmem:[#allocation3 + $0x80] sm:$0xff] %vm1568_vm7, %v1505_v31  ;;  %v1475_v18 = vpop.permute.xlu1 %1474 }
 0x1cc   : > { %1516 = vrot.lane.b32.xlu0 %v3592_v55, %s3165_s19  ;;  %1570 = vst.msk [vmem:[#allocation3 + $0x8] sm:$0xff] %vm1568_vm7, %v1475_v18  ;;  %v2643_v18 = vld [vmem:[%s3394_s10 + $0xa8] sm:$0xff] }
 0x1cd   : > { %1486 = vrot.lane.b32.xlu1 %v3490_v34, %s3165_s19 }
 0x1ce   : > { %v1507_v19 = vpop.permute.xlu0 %1506 }
 0x1cf   : > { %1586 = vst.msk [vmem:[#allocation3 + $0x88] sm:$0xff] %vm1568_vm7, %v1507_v19  ;;  %v1666_v15 = vpop.permute.xlu1 %1665 }
 0x1d0   : > { %1518 = vrot.lane.b32.xlu0 %v3595_v56, %s3165_s19  ;;  %1762 = vst.msk [vmem:[#allocation3] sm:$0xff] %vm1761_vm8, %v1666_v15  ;;  %v2672_v56 = vld [vmem:[%s3394_s10 + $0x81] sm:$0xff] }
 0x1d1   : > { %1677 = vrot.lane.b32.xlu1 %v2671_v6, %s3166_s11 }
 0x1d2   : > { %v1698_v55 = vpop.permute.xlu0 %1697 }
 0x1d3   : > { %1778 = vst.msk [vmem:[#allocation3 + $0x80] sm:$0xff] %vm1761_vm8, %v1698_v55  ;;  %v1120_v34 = vpop.permute.xlu1 %1119 }
 0x1d4   : > { %1709 = vrot.lane.b32.xlu0 %v2687_v33, %s3166_s11  ;;  %1198 = vst.msk [vmem:[#allocation3 + $0x90] sm:$0xff] %vm1179_vm5, %v1120_v34  ;;  %v2660_v34 = vld [vmem:[%s3394_s10 + $0x170] sm:$0xff] }
 0x1d5   : > { %1099 = vrot.lane.b32.xlu1 %v2671_v6, %s3163_s7  ;;  %v2659_v6 = vld [vmem:[%s3394_s10 + $0x168] sm:$0xff] }
 0x1d6   : > { %v1668_v1 = vpop.permute.xlu0 %1667 }
 0x1d7   : > { %1763 = vst.msk [vmem:[#allocation3 + $0x8] sm:$0xff] %vm1761_vm8, %v1668_v1  ;;  %v1700_v27 = vpop.permute.xlu1 %1699 }
 0x1d8   : > { %1131 = vrot.lane.b32.xlu0 %v2687_v33, %s3163_s7  ;;  %1779 = vst.msk [vmem:[#allocation3 + $0x88] sm:$0xff] %vm1761_vm8, %v1700_v27  ;;  %v2644_v33 = vld [vmem:[%s3394_s10 + $0xb0] sm:$0xff] }
 0x1d9   : > { %1679 = vrot.lane.b32.xlu1 %v2672_v56, %s3166_s11 }
 0x1da   : > { %v1859_v2 = vpop.permute.xlu0 %1858 }
 0x1db   : > { %1955 = vst.msk [vmem:[#allocation3] sm:$0xff] %vm1954_vm9, %v1859_v2  ;;  %v1891_v32 = vpop.permute.xlu1 %1890 }
 0x1dc   : > { %1711 = vrot.lane.b32.xlu0 %v2688_v47, %s3166_s11  ;;  %1971 = vst.msk [vmem:[#allocation3 + $0x80] sm:$0xff] %vm1954_vm9, %v1891_v32 }
 0x1dd   : > { %1870 = vrot.lane.b32.xlu1 %v2703_v28, %s3167_s23 }
 0x1de   : > { %v1122_v21 = vpop.permute.xlu0 %1121 }
 0x1df   : > { %1199 = vst.msk [vmem:[#allocation3 + $0x98] sm:$0xff] %vm1179_vm5, %v1122_v21  ;;  %v1281_v14 = vpop.permute.xlu1 %1280 }
 0x1e0   : > { %1902 = vrot.lane.b32.xlu0 %v2719_v48, %s3167_s23  ;;  %1375 = vst.msk [vmem:[#allocation3 + $0x10] sm:$0xff] %vm1372_vm6, %v1281_v14  ;;  %v2692_v14 = vld [vmem:[%s3394_s10 + $0x171] sm:$0xff] }
 0x1e1   : > { %1101 = vrot.lane.b32.xlu1 %v2672_v56, %s3163_s7  ;;  %v2675_v56 = vld [vmem:[%s3394_s10 + $0xa9] sm:$0xff] }
 0x1e2   : > { %v1313_v7 = vpop.permute.xlu0 %1312  ;;  %v1987_v8 = vld [vmem:[#allocation3] sm:$0xff] }
 0x1e3   : > { %1391 = vst.msk [vmem:[#allocation3 + $0x90] sm:$0xff] %vm1372_vm6, %v1313_v7  ;;  %2815 = vmatprep.mubr.msk.f32.mxu0 %vm2024_vm10, %v1987_v8  ;;  %v1861_v11 = vpop.permute.xlu1 %1860  ;;  %v2003_v35 = vld [vmem:[#allocation3 + $0x80] sm:$0xff] }
 0x1e4   : > { %1133 = vrot.lane.b32.xlu0 %v2688_v47, %s3163_s7  ;;  %1956 = vst.msk [vmem:[#allocation3 + $0x8] sm:$0xff] %vm1954_vm9, %v1861_v11  ;;  %2839 = vmatprep.mubr.msk.f32.mxu1 %vm2024_vm10, %v2003_v35  ;;  %v2691_v47 = vld [vmem:[%s3394_s10 + $0x169] sm:$0xff] }
 0x1e5   : > { %1292 = vrot.lane.b32.xlu1 %v2703_v28, %s3164_s9  ;;  %v2707_v8 = vld [vmem:[%s3394_s10 + $0xaa] sm:$0xff] }
 0x1e6   : > { %v1893_v0 = vpop.permute.xlu0 %1892  ;;  %v2723_v35 = vld [vmem:[%s3394_s10 + $0x16a] sm:$0xff] }
 0x1e7   : > { %1972 = vst.msk [vmem:[#allocation3 + $0x88] sm:$0xff] %vm1954_vm9, %v1893_v0  ;;  %v1283_v37 = vpop.permute.xlu1 %1282 }
 0x1e8   : > { %1324 = vrot.lane.b32.xlu0 %v2719_v48, %s3164_s9  ;;  %1376 = vst.msk [vmem:[#allocation3 + $0x18] sm:$0xff] %vm1372_vm6, %v1283_v37  ;;  %v2676_v48 = vld [vmem:[%s3394_s10 + $0xb1] sm:$0xff] }
 0x1e9   : > { %1872 = vrot.lane.b32.xlu1 %v2704_v36, %s3167_s23 }
 0x1ea   : > { %v1315_v39 = vpop.permute.xlu0 %1314 }
 0x1eb   : > { %1392 = vst.msk [vmem:[#allocation3 + $0x98] sm:$0xff] %vm1372_vm6, %v1315_v39  ;;  %v1477_v61 = vpop.permute.xlu1 %1476  ;;  %v1988_v25 = vld [vmem:[#allocation3 + $0x8] sm:$0xff] }
 0x1ec   : > { %1904 = vrot.lane.b32.xlu0 %v2720_v38, %s3167_s23  ;;  %1571 = vst.msk [vmem:[#allocation3 + $0x10] sm:$0xff] %vm1568_vm7, %v1477_v61  ;;  %2816 = vmatmul.mubr.msk.f32.vlgmr.msra.gmra.mrb[0].mxu0 %vm2024_vm10, %v1988_v25 }
 0x1ed   : > { %1294 = vrot.lane.b32.xlu1 %v2704_v36, %s3164_s9 }
 0x1ee   : > { %v1509_v62 = vpop.permute.xlu0 %1508  ;;  %v2004_v22 = vld [vmem:[#allocation3 + $0x88] sm:$0xff] }
 0x1ef   : > { %1587 = vst.msk [vmem:[#allocation3 + $0x90] sm:$0xff] %vm1568_vm7, %v1509_v62  ;;  %2840 = vmatmul.mubr.msk.f32.vlgmr.msra.gmra.mrb[0].mxu1 %vm2024_vm10, %v2004_v22  ;;  %v1479_v40 = vpop.permute.xlu1 %1478  ;;  %v2708_v62 = vld [vmem:[%s3394_s10 + $0xb2] sm:$0xff] }
 0x1f0   : > { %1326 = vrot.lane.b32.xlu0 %v2720_v38, %s3164_s9  ;;  %1572 = vst.msk [vmem:[#allocation3 + $0x18] sm:$0xff] %vm1568_vm7, %v1479_v40 }
 0x1f1   : > { %1488 = vrot.lane.b32.xlu1 %v2641_v5, %s3165_s19  ;;  %v2724_v5 = vld [vmem:[%s3394_s10 + $0x172] sm:$0xff] }
 0x1f2   : > { %v1511_v4 = vpop.permute.xlu0 %1510 }
 0x1f3   : > { %1588 = vst.msk [vmem:[#allocation3 + $0x98] sm:$0xff] %vm1568_vm7, %v1511_v4  ;;  %v1670_v46 = vpop.permute.xlu1 %1669 }
 0x1f4   : > { %1520 = vrot.lane.b32.xlu0 %v3607_v59, %s3165_s19  ;;  %1764 = vst.msk [vmem:[#allocation3 + $0x10] sm:$0xff] %vm1761_vm8, %v1670_v46 }
 0x1f5   : > { %1490 = vrot.lane.b32.xlu1 %v2642_v41, %s3165_s19 }
 0x1f6   : > { %v1702_v20 = vpop.permute.xlu0 %1701 }
 0x1f7   : > { %1780 = vst.msk [vmem:[#allocation3 + $0x90] sm:$0xff] %vm1761_vm8, %v1702_v20  ;;  %v1092_v12 = vpop.permute.xlu1 %1091 }
 0x1f8   : > { %1522 = vrot.lane.b32.xlu0 %v3610_v60, %s3165_s19  ;;  %1184 = vst.msk [vmem:[#allocation3 + $0x20] sm:$0xff] %vm1179_vm5, %v1092_v12  ;;  %v2674_v60 = vld [vmem:[%s3394_s10 + $0x99] sm:$0xff] }
 0x1f9   : > { %1681 = vrot.lane.b32.xlu1 %v2673_v49, %s3166_s11 }
 0x1fa   : > { %v1124_v59 = vpop.permute.xlu0 %1123 }
 0x1fb   : > { %1200 = vst.msk [vmem:[#allocation3 + $0xa0] sm:$0xff] %vm1179_vm5, %v1124_v59  ;;  %v1672_v51 = vpop.permute.xlu1 %1671 }
 0x1fc   : > { %1713 = vrot.lane.b32.xlu0 %v2689_v29, %s3166_s11  ;;  %1765 = vst.msk [vmem:[#allocation3 + $0x18] sm:$0xff] %vm1761_vm8, %v1672_v51  ;;  %v2646_v51 = vld [vmem:[%s3394_s10 + $0xc8] sm:$0xff] }
 0x1fd   : > { %1103 = vrot.lane.b32.xlu1 %v2673_v49, %s3163_s7  ;;  %v2645_v49 = vld [vmem:[%s3394_s10 + $0xc0] sm:$0xff] }
 0x1fe   : > { %v1704_v30 = vpop.permute.xlu0 %1703 }
 0x1ff   : > { %1781 = vst.msk [vmem:[#allocation3 + $0x98] sm:$0xff] %vm1761_vm8, %v1704_v30  ;;  %v1863_v13 = vpop.permute.xlu1 %1862 }
 0x200   : > { %1135 = vrot.lane.b32.xlu0 %v2689_v29, %s3163_s7  ;;  %1957 = vst.msk [vmem:[#allocation3 + $0x10] sm:$0xff] %vm1954_vm9, %v1863_v13  ;;  %v2661_v29 = vld [vmem:[%s3394_s10 + $0x180] sm:$0xff] }
 0x201   : > { %1683 = vrot.lane.b32.xlu1 %v2674_v60, %s3166_s11 }
 0x202   : > { %v1895_v58 = vpop.permute.xlu0 %1894 }
 0x203   : > { %1973 = vst.msk [vmem:[#allocation3 + $0x90] sm:$0xff] %vm1954_vm9, %v1895_v58  ;;  %v1094_v63 = vpop.permute.xlu1 %1093 }
 0x204   : > { %1715 = vrot.lane.b32.xlu0 %v2690_v52, %s3166_s11  ;;  %1185 = vst.msk [vmem:[#allocation3 + $0x28] sm:$0xff] %vm1179_vm5, %v1094_v63 }
 0x205   : > { %1874 = vrot.lane.b32.xlu1 %v2705_v24, %s3167_s23 }
 0x206   : > { %v1126_v43 = vpop.permute.xlu0 %1125 }
 0x207   : > { %1201 = vst.msk [vmem:[#allocation3 + $0xa8] sm:$0xff] %vm1179_vm5, %v1126_v43  ;;  %v1285_v10 = vpop.permute.xlu1 %1284  ;;  %v1989_v44 = vld [vmem:[#allocation3 + $0x10] sm:$0xff] }
 0x208   : > { %1906 = vrot.lane.b32.xlu0 %v2721_v23, %s3167_s23  ;;  %1377 = vst.msk [vmem:[#allocation3 + $0x20] sm:$0xff] %vm1372_vm6, %v1285_v10  ;;  %2818 = vmatprep.mubr.msk.f32.mxu0 %vm2024_vm10, %v1989_v44  ;;  %v2678_v10 = vld [vmem:[%s3394_s10 + $0xc9] sm:$0xff] }
 0x209   : > { %1105 = vrot.lane.b32.xlu1 %v2674_v60, %s3163_s7  ;;  %v2662_v60 = vld [vmem:[%s3394_s10 + $0x188] sm:$0xff] }
 0x20a   : > { %v1317_v50 = vpop.permute.xlu0 %1316  ;;  %v2005_v26 = vld [vmem:[#allocation3 + $0x90] sm:$0xff] }
 0x20b   : > { %1393 = vst.msk [vmem:[#allocation3 + $0xa0] sm:$0xff] %vm1372_vm6, %v1317_v50  ;;  %2842 = vmatprep.mubr.msk.f32.mxu1 %vm2024_vm10, %v2005_v26  ;;  %v1865_v42 = vpop.permute.xlu1 %1864  ;;  %v2694_v50 = vld [vmem:[%s3394_s10 + $0x189] sm:$0xff] }
 0x20c   : > { %1137 = vrot.lane.b32.xlu0 %v2690_v52, %s3163_s7  ;;  %1958 = vst.msk [vmem:[#allocation3 + $0x18] sm:$0xff] %vm1954_vm9, %v1865_v42  ;;  %v2677_v52 = vld [vmem:[%s3394_s10 + $0xc1] sm:$0xff] }
 0x20d   : > { %1296 = vrot.lane.b32.xlu1 %v2705_v24, %s3164_s9  ;;  %v2693_v24 = vld [vmem:[%s3394_s10 + $0x181] sm:$0xff] }
 0x20e   : > { %v1897_v54 = vpop.permute.xlu0 %1896  ;;  %v2709_v42 = vld [vmem:[%s3394_s10 + $0xc2] sm:$0xff] }
 0x20f   : > { %1974 = vst.msk [vmem:[#allocation3 + $0x98] sm:$0xff] %vm1954_vm9, %v1897_v54  ;;  %v1287_v57 = vpop.permute.xlu1 %1286 }
 0x210   : > { %1328 = vrot.lane.b32.xlu0 %v2721_v23, %s3164_s9  ;;  %1378 = vst.msk [vmem:[#allocation3 + $0x28] sm:$0xff] %vm1372_vm6, %v1287_v57 }
 0x211   : > { %1876 = vrot.lane.b32.xlu1 %v2706_v9, %s3167_s23 }
 0x212   : > { %v1319_v17 = vpop.permute.xlu0 %1318 }
 0x213   : > { %1394 = vst.msk [vmem:[#allocation3 + $0xa8] sm:$0xff] %vm1372_vm6, %v1319_v17  ;;  %v1481_v53 = vpop.permute.xlu1 %1480  ;;  %v1990_v16 = vld [vmem:[#allocation3 + $0x18] sm:$0xff] }
 0x214   : > { %1908 = vrot.lane.b32.xlu0 %v2722_v3, %s3167_s23  ;;  %1573 = vst.msk [vmem:[#allocation3 + $0x20] sm:$0xff] %vm1568_vm7, %v1481_v53  ;;  %2819 = vmatmul.mubr.msk.f32.gmra.mrb[2].mxu0 %vm2024_vm10, %v1990_v16 }
 0x215   : > { %1298 = vrot.lane.b32.xlu1 %v2706_v9, %s3164_s9  ;;  %v2725_v9 = vld [vmem:[%s3394_s10 + $0x182] sm:$0xff] }
 0x216   : > { %v1513_v45 = vpop.permute.xlu0 %1512  ;;  %v2006_v31 = vld [vmem:[#allocation3 + $0x98] sm:$0xff] }
 0x217   : > { %1589 = vst.msk [vmem:[#allocation3 + $0xa0] sm:$0xff] %vm1568_vm7, %v1513_v45  ;;  %2843 = vmatmul.mubr.msk.f32.gmra.mrb[2].mxu1 %vm2024_vm10, %v2006_v31  ;;  %v1483_v19 = vpop.permute.xlu1 %1482 }
 0x218   : > { %1330 = vrot.lane.b32.xlu0 %v2722_v3, %s3164_s9  ;;  %1574 = vst.msk [vmem:[#allocation3 + $0x28] sm:$0xff] %vm1568_vm7, %v1483_v19 }
 0x219   : > { %1492 = vrot.lane.b32.xlu1 %v2643_v18, %s3165_s19  ;;  %v2710_v18 = vld [vmem:[%s3394_s10 + $0xca] sm:$0xff] }
 0x21a   : > { %v1515_v15 = vpop.permute.xlu0 %1514 }
 0x21b   : > { %1590 = vst.msk [vmem:[#allocation3 + $0xa8] sm:$0xff] %vm1568_vm7, %v1515_v15  ;;  %v1674_v55 = vpop.permute.xlu1 %1673 }
 0x21c   : > { %1524 = vrot.lane.b32.xlu0 %v2659_v6, %s3165_s19  ;;  %1766 = vst.msk [vmem:[#allocation3 + $0x20] sm:$0xff] %vm1761_vm8, %v1674_v55  ;;  %v2726_v6 = vld [vmem:[%s3394_s10 + $0x18a] sm:$0xff] }
 0x21d   : > { %1494 = vrot.lane.b32.xlu1 %v2644_v33, %s3165_s19 }
 0x21e   : > { %v1706_v1 = vpop.permute.xlu0 %1705 }
 0x21f   : > { %1782 = vst.msk [vmem:[#allocation3 + $0xa0] sm:$0xff] %vm1761_vm8, %v1706_v1  ;;  %v1096_v27 = vpop.permute.xlu1 %1095 }
 0x220   : > { %1526 = vrot.lane.b32.xlu0 %v2660_v34, %s3165_s19  ;;  %1186 = vst.msk [vmem:[#allocation3 + $0x30] sm:$0xff] %vm1179_vm5, %v1096_v27 }
 0x221   : > { %1685 = vrot.lane.b32.xlu1 %v2675_v56, %s3166_s11 }
 0x222   : > { %v1128_v2 = vpop.permute.xlu0 %1127 }
 0x223   : > { %1202 = vst.msk [vmem:[#allocation3 + $0xb0] sm:$0xff] %vm1179_vm5, %v1128_v2  ;;  %v1676_v28 = vpop.permute.xlu1 %1675 }
 0x224   : > { %1717 = vrot.lane.b32.xlu0 %v2691_v47, %s3166_s11  ;;  %1767 = vst.msk [vmem:[#allocation3 + $0x28] sm:$0xff] %vm1761_vm8, %v1676_v28  ;;  %v2648_v28 = vld [vmem:[%s3394_s10 + $0xe0] sm:$0xff] }
 0x225   : > { %1107 = vrot.lane.b32.xlu1 %v2675_v56, %s3163_s7  ;;  %v2647_v56 = vld [vmem:[%s3394_s10 + $0xd8] sm:$0xff] }
 0x226   : > { %v1708_v32 = vpop.permute.xlu0 %1707 }
 0x227   : > { %1783 = vst.msk [vmem:[#allocation3 + $0xa8] sm:$0xff] %vm1761_vm8, %v1708_v32  ;;  %v1867_v21 = vpop.permute.xlu1 %1866 }
 0x228   : > { %1139 = vrot.lane.b32.xlu0 %v2691_v47, %s3163_s7  ;;  %1959 = vst.msk [vmem:[#allocation3 + $0x20] sm:$0xff] %vm1954_vm9, %v1867_v21  ;;  %v2663_v47 = vld [vmem:[%s3394_s10 + $0x198] sm:$0xff] }
 0x229   : > { %1687 = vrot.lane.b32.xlu1 %v2676_v48, %s3166_s11 }
 0x22a   : > { %v1899_v7 = vpop.permute.xlu0 %1898 }
 0x22b   : > { %1975 = vst.msk [vmem:[#allocation3 + $0xa0] sm:$0xff] %vm1954_vm9, %v1899_v7  ;;  %v1098_v11 = vpop.permute.xlu1 %1097 }
 0x22c   : > { %1719 = vrot.lane.b32.xlu0 %v2692_v14, %s3166_s11  ;;  %1187 = vst.msk [vmem:[#allocation3 + $0x38] sm:$0xff] %vm1179_vm5, %v1098_v11 }
 0x22d   : > { %1878 = vrot.lane.b32.xlu1 %v2707_v8, %s3167_s23 }
 0x22e   : > { %v1130_v0 = vpop.permute.xlu0 %1129 }
 0x22f   : > { %1203 = vst.msk [vmem:[#allocation3 + $0xb8] sm:$0xff] %vm1179_vm5, %v1130_v0  ;;  %v1289_v36 = vpop.permute.xlu1 %1288  ;;  %v1991_v37 = vld [vmem:[#allocation3 + $0x20] sm:$0xff] }
 0x230   : > { %1910 = vrot.lane.b32.xlu0 %v2723_v35, %s3167_s23  ;;  %1379 = vst.msk [vmem:[#allocation3 + $0x30] sm:$0xff] %vm1372_vm6, %v1289_v36  ;;  %2821 = vmatprep.mubr.msk.f32.mxu0 %vm2024_vm10, %v1991_v37  ;;  %v2696_v36 = vld [vmem:[%s3394_s10 + $0x1a1] sm:$0xff] }
 0x231   : > { %1109 = vrot.lane.b32.xlu1 %v2676_v48, %s3163_s7  ;;  %v2664_v48 = vld [vmem:[%s3394_s10 + $0x1a0] sm:$0xff] }
 0x232   : > { %v1321_v38 = vpop.permute.xlu0 %1320  ;;  %v2007_v39 = vld [vmem:[#allocation3 + $0xa0] sm:$0xff] }
 0x233   : > { %1395 = vst.msk [vmem:[#allocation3 + $0xb0] sm:$0xff] %vm1372_vm6, %v1321_v38  ;;  %2845 = vmatprep.mubr.msk.f32.mxu1 %vm2024_vm10, %v2007_v39  ;;  %v1869_v61 = vpop.permute.xlu1 %1868  ;;  %v2711_v38 = vld [vmem:[%s3394_s10 + $0xda] sm:$0xff] }
 0x234   : > { %1141 = vrot.lane.b32.xlu0 %v2692_v14, %s3163_s7  ;;  %1960 = vst.msk [vmem:[#allocation3 + $0x28] sm:$0xff] %vm1954_vm9, %v1869_v61  ;;  %v2679_v14 = vld [vmem:[%s3394_s10 + $0xd9] sm:$0xff] }
 0x235   : > { %1300 = vrot.lane.b32.xlu1 %v2707_v8, %s3164_s9  ;;  %v2695_v8 = vld [vmem:[%s3394_s10 + $0x199] sm:$0xff] }
 0x236   : > { %v1901_v25 = vpop.permute.xlu0 %1900  ;;  %v2727_v61 = vld [vmem:[%s3394_s10 + $0x19a] sm:$0xff] }
 0x237   : > { %1976 = vst.msk [vmem:[#allocation3 + $0xa8] sm:$0xff] %vm1954_vm9, %v1901_v25  ;;  %v1291_v22 = vpop.permute.xlu1 %1290 }
 0x238   : > { %1332 = vrot.lane.b32.xlu0 %v2723_v35, %s3164_s9  ;;  %1380 = vst.msk [vmem:[#allocation3 + $0x38] sm:$0xff] %vm1372_vm6, %v1291_v22  ;;  %v2680_v35 = vld [vmem:[%s3394_s10 + $0xe1] sm:$0xff] }
 0x239   : > { %1880 = vrot.lane.b32.xlu1 %v2708_v62, %s3167_s23 }
 0x23a   : > { %v1323_v40 = vpop.permute.xlu0 %1322 }
 0x23b   : > { %1396 = vst.msk [vmem:[#allocation3 + $0xb8] sm:$0xff] %vm1372_vm6, %v1323_v40  ;;  %v1485_v4 = vpop.permute.xlu1 %1484  ;;  %v1992_v41 = vld [vmem:[#allocation3 + $0x28] sm:$0xff] }
 0x23c   : > { %1912 = vrot.lane.b32.xlu0 %v2724_v5, %s3167_s23  ;;  %1575 = vst.msk [vmem:[#allocation3 + $0x30] sm:$0xff] %vm1568_vm7, %v1485_v4  ;;  %2822 = vmatmul.mubr.msk.f32.gmra.mrb[4].mxu0 %vm2024_vm10, %v1992_v41 }
 0x23d   : > { %1302 = vrot.lane.b32.xlu1 %v2708_v62, %s3164_s9  ;;  %v2712_v62 = vld [vmem:[%s3394_s10 + $0xe2] sm:$0xff] }
 0x23e   : > { %v1517_v46 = vpop.permute.xlu0 %1516  ;;  %v2008_v20 = vld [vmem:[#allocation3 + $0xa8] sm:$0xff] }
 0x23f   : > { %1591 = vst.msk [vmem:[#allocation3 + $0xb0] sm:$0xff] %vm1568_vm7, %v1517_v46  ;;  %2846 = vmatmul.mubr.msk.f32.gmra.mrb[4].mxu1 %vm2024_vm10, %v2008_v20  ;;  %v1487_v12 = vpop.permute.xlu1 %1486 }
 0x240   : > { %1334 = vrot.lane.b32.xlu0 %v2724_v5, %s3164_s9  ;;  %1576 = vst.msk [vmem:[#allocation3 + $0x38] sm:$0xff] %vm1568_vm7, %v1487_v12  ;;  %v2728_v5 = vld [vmem:[%s3394_s10 + $0x1a2] sm:$0xff]  ;;  %s3065_s10 = sshll.u32 %s3168_s8, 4  ;;  %s3066_s10 = int_to_ptr.vmem [resolvable:$false] %s3065_s10 }
 0x241   : > { %1496 = vrot.lane.b32.xlu1 %v2645_v49, %s3165_s19  ;;  %s3067_s28 = scalar_lea.vmem %s3066_s10, 8192  ;;  %p3068_p0 = scmp.lt.s32.totalorder %s4456_s6, %s3066_s10 }
 0x242   : > { %v1519_v59 = vpop.permute.xlu0 %1518  ;;  %p3069_p3 = scmp.lt.s32.totalorder %s3067_s28, %s3061_s5 }
 0x243   : > { %1592 = vst.msk [vmem:[#allocation3 + $0xb8] sm:$0xff] %vm1568_vm7, %v1519_v59  ;;  %v1678_v30 = vpop.permute.xlu1 %1677 }
 0x244   : > { %1528 = vrot.lane.b32.xlu0 %v2661_v29, %s3165_s19  ;;  %1768 = vst.msk [vmem:[#allocation3 + $0x30] sm:$0xff] %vm1761_vm8, %v1678_v30  ;;  %p3070_p2 = por %p3069_p3, %p3068_p0 }
 0x245   : > { %1498 = vrot.lane.b32.xlu1 %v2646_v51, %s3165_s19 }
 0x246   : > { %v1710_v13 = vpop.permute.xlu0 %1709  ;;  %p3071_p5 = pnand %p3070_p2, %p3064_p7 }
 0x247   : > { %1784 = vst.msk [vmem:[#allocation3 + $0xb0] sm:$0xff] %vm1761_vm8, %v1710_v13  ;;  %v1100_v58 = vpop.permute.xlu1 %1099 }
 0x248   : > { %1530 = vrot.lane.b32.xlu0 %v2662_v60, %s3165_s19  ;;  %1188 = vst.msk [vmem:[#allocation3 + $0x40] sm:$0xff] %vm1179_vm5, %v1100_v58 }
 0x249   : > { %1689 = vrot.lane.b32.xlu1 %v2677_v52, %s3166_s11 }
 0x24a   : > { %v1132_v63 = vpop.permute.xlu0 %1131 }
 0x24b   : > { %1204 = vst.msk [vmem:[#allocation3 + $0xc0] sm:$0xff] %vm1179_vm5, %v1132_v63  ;;  %v1680_v23 = vpop.permute.xlu1 %1679 }
 0x24c   : > { %1721 = vrot.lane.b32.xlu0 %v2693_v24, %s3166_s11  ;;  %1769 = vst.msk [vmem:[#allocation3 + $0x38] sm:$0xff] %vm1761_vm8, %v1680_v23 }
 0x24d   : > { %1111 = vrot.lane.b32.xlu1 %v2677_v52, %s3163_s7 }
 0x24e   : > { %v1712_v43 = vpop.permute.xlu0 %1711 }
 0x24f   : > { %1785 = vst.msk [vmem:[#allocation3 + $0xb8] sm:$0xff] %vm1761_vm8, %v1712_v43  ;;  %v1871_v44 = vpop.permute.xlu1 %1870 }
 0x250   : > { %1143 = vrot.lane.b32.xlu0 %v2693_v24, %s3163_s7  ;;  %1961 = vst.msk [vmem:[#allocation3 + $0x30] sm:$0xff] %vm1954_vm9, %v1871_v44 }
 0x251   : > { %1691 = vrot.lane.b32.xlu1 %v2678_v10, %s3166_s11 }
 0x252   : > { %v1903_v26 = vpop.permute.xlu0 %1902 }
 0x253   : > { %1977 = vst.msk [vmem:[#allocation3 + $0xb0] sm:$0xff] %vm1954_vm9, %v1903_v26  ;;  %v1102_v54 = vpop.permute.xlu1 %1101 }
 0x254   : > { %1723 = vrot.lane.b32.xlu0 %v2694_v50, %s3166_s11  ;;  %1189 = vst.msk [vmem:[#allocation3 + $0x48] sm:$0xff] %vm1179_vm5, %v1102_v54 }
 0x255   : > { %1882 = vrot.lane.b32.xlu1 %v2709_v42, %s3167_s23 }
 0x256   : > { %v1134_v57 = vpop.permute.xlu0 %1133 }
 0x257   : > { %1205 = vst.msk [vmem:[#allocation3 + $0xc8] sm:$0xff] %vm1179_vm5, %v1134_v57  ;;  %v1293_v3 = vpop.permute.xlu1 %1292  ;;  %v1993_v17 = vld [vmem:[#allocation3 + $0x30] sm:$0xff] }
 0x258   : > { %1914 = vrot.lane.b32.xlu0 %v2725_v9, %s3167_s23  ;;  %1381 = vst.msk [vmem:[#allocation3 + $0x40] sm:$0xff] %vm1372_vm6, %v1293_v3  ;;  %2824 = vmatprep.mubr.msk.f32.mxu0 %vm2024_vm10, %v1993_v17 }
 0x259   : > { %1113 = vrot.lane.b32.xlu1 %v2678_v10, %s3163_s7 }
 0x25a   : > { %v1325_v53 = vpop.permute.xlu0 %1324  ;;  %v2009_v16 = vld [vmem:[#allocation3 + $0xb0] sm:$0xff] }
 0x25b   : > { %1397 = vst.msk [vmem:[#allocation3 + $0xc0] sm:$0xff] %vm1372_vm6, %v1325_v53  ;;  %2848 = vmatprep.mubr.msk.f32.mxu1 %vm2024_vm10, %v2009_v16  ;;  %v1873_v45 = vpop.permute.xlu1 %1872 }
 0x25c   : > { %1145 = vrot.lane.b32.xlu0 %v2694_v50, %s3163_s7  ;;  %1962 = vst.msk [vmem:[#allocation3 + $0x38] sm:$0xff] %vm1954_vm9, %v1873_v45 }
 0x25d   : > { %1304 = vrot.lane.b32.xlu1 %v2709_v42, %s3164_s9 }
 0x25e   : > { %v1905_v31 = vpop.permute.xlu0 %1904 }
 0x25f   : > { %1978 = vst.msk [vmem:[#allocation3 + $0xb8] sm:$0xff] %vm1954_vm9, %v1905_v31  ;;  %v1295_v19 = vpop.permute.xlu1 %1294 }
 0x260   : > { %1336 = vrot.lane.b32.xlu0 %v2725_v9, %s3164_s9  ;;  %1382 = vst.msk [vmem:[#allocation3 + $0x48] sm:$0xff] %vm1372_vm6, %v1295_v19 }
 0x261   : > { %1884 = vrot.lane.b32.xlu1 %v2710_v18, %s3167_s23 }
 0x262   : > { %v1327_v15 = vpop.permute.xlu0 %1326 }
 0x263   : > { %1398 = vst.msk [vmem:[#allocation3 + $0xc8] sm:$0xff] %vm1372_vm6, %v1327_v15  ;;  %v1489_v33 = vpop.permute.xlu1 %1488  ;;  %v1994_v55 = vld [vmem:[#allocation3 + $0x38] sm:$0xff] }
 0x264   : > { %1916 = vrot.lane.b32.xlu0 %v2726_v6, %s3167_s23  ;;  %1577 = vst.msk [vmem:[#allocation3 + $0x40] sm:$0xff] %vm1568_vm7, %v1489_v33  ;;  %2825 = vmatmul.mubr.msk.f32.gmra.mrb[6].mxu0 %vm2024_vm10, %v1994_v55 }
 0x265   : > { %1306 = vrot.lane.b32.xlu1 %v2710_v18, %s3164_s9 }
 0x266   : > { %v1521_v34 = vpop.permute.xlu0 %1520  ;;  %v2010_v1 = vld [vmem:[#allocation3 + $0xb8] sm:$0xff] }
 0x267   : > { %1593 = vst.msk [vmem:[#allocation3 + $0xc0] sm:$0xff] %vm1568_vm7, %v1521_v34  ;;  %2849 = vmatmul.mubr.msk.f32.gmra.mrb[6].mxu1 %vm2024_vm10, %v2010_v1  ;;  %v1491_v27 = vpop.permute.xlu1 %1490 }
 0x268   : > { %1338 = vrot.lane.b32.xlu0 %v2726_v6, %s3164_s9  ;;  %1578 = vst.msk [vmem:[#allocation3 + $0x48] sm:$0xff] %vm1568_vm7, %v1491_v27 }
 0x269   : > { %1500 = vrot.lane.b32.xlu1 %v2647_v56, %s3165_s19 }
 0x26a   : > { %v1523_v2 = vpop.permute.xlu0 %1522 }
 0x26b   : > { %1594 = vst.msk [vmem:[#allocation3 + $0xc8] sm:$0xff] %vm1568_vm7, %v1523_v2  ;;  %v1682_v32 = vpop.permute.xlu1 %1681 }
 0x26c   : > { %1532 = vrot.lane.b32.xlu0 %v2663_v47, %s3165_s19  ;;  %1770 = vst.msk [vmem:[#allocation3 + $0x40] sm:$0xff] %vm1761_vm8, %v1682_v32 }
 0x26d   : > { %1502 = vrot.lane.b32.xlu1 %v2648_v28, %s3165_s19 }
 0x26e   : > { %v1714_v21 = vpop.permute.xlu0 %1713 }
 0x26f   : > { %1786 = vst.msk [vmem:[#allocation3 + $0xc0] sm:$0xff] %vm1761_vm8, %v1714_v21  ;;  %v1104_v7 = vpop.permute.xlu1 %1103 }
 0x270   : > { %1534 = vrot.lane.b32.xlu0 %v2664_v48, %s3165_s19  ;;  %1190 = vst.msk [vmem:[#allocation3 + $0x50] sm:$0xff] %vm1179_vm5, %v1104_v7 }
 0x271   : > { %1693 = vrot.lane.b32.xlu1 %v2679_v14, %s3166_s11 }
 0x272   : > { %v1136_v11 = vpop.permute.xlu0 %1135 }
 0x273   : > { %1206 = vst.msk [vmem:[#allocation3 + $0xd0] sm:$0xff] %vm1179_vm5, %v1136_v11  ;;  %v1684_v0 = vpop.permute.xlu1 %1683 }
 0x274   : > { %1725 = vrot.lane.b32.xlu0 %v2695_v8, %s3166_s11  ;;  %1771 = vst.msk [vmem:[#allocation3 + $0x48] sm:$0xff] %vm1761_vm8, %v1684_v0 }
 0x275   : > { %1695 = vrot.lane.b32.xlu1 %v2680_v35, %s3166_s11 }
 0x276   : > { %v1716_v37 = vpop.permute.xlu0 %1715 }
 0x277   : > { %1787 = vst.msk [vmem:[#allocation3 + $0xc8] sm:$0xff] %vm1761_vm8, %v1716_v37  ;;  %v1875_v39 = vpop.permute.xlu1 %1874 }
 0x278   : > { %1727 = vrot.lane.b32.xlu0 %v2696_v36, %s3166_s11  ;;  %1963 = vst.msk [vmem:[#allocation3 + $0x40] sm:$0xff] %vm1954_vm9, %v1875_v39 }
 0x279   : > { %1886 = vrot.lane.b32.xlu1 %v2711_v38, %s3167_s23 }
 0x27a   : > { %v1907_v25 = vpop.permute.xlu0 %1906 }
 0x27b   : > { %1979 = vst.msk [vmem:[#allocation3 + $0xc0] sm:$0xff] %vm1954_vm9, %v1907_v25  ;;  %v1106_v22 = vpop.permute.xlu1 %1105 }
 0x27c   : > { %1918 = vrot.lane.b32.xlu0 %v2727_v61, %s3167_s23  ;;  %1191 = vst.msk [vmem:[#allocation3 + $0x58] sm:$0xff] %vm1179_vm5, %v1106_v22 }
 0x27d   : > { %1888 = vrot.lane.b32.xlu1 %v2712_v62, %s3167_s23 }
 0x27e   : > { %v1138_v40 = vpop.permute.xlu0 %1137 }
 0x27f   : > { %1207 = vst.msk [vmem:[#allocation3 + $0xd8] sm:$0xff] %vm1179_vm5, %v1138_v40  ;;  %v1297_v4 = vpop.permute.xlu1 %1296  ;;  %v1995_v41 = vld [vmem:[#allocation3 + $0x40] sm:$0xff] }
 0x280   : > { %1920 = vrot.lane.b32.xlu0 %v2728_v5, %s3167_s23  ;;  %1383 = vst.msk [vmem:[#allocation3 + $0x50] sm:$0xff] %vm1372_vm6, %v1297_v4  ;;  %2827 = vmatprep.mubr.msk.f32.mxu0 %vm2024_vm10, %v1995_v41 }
 0x282   : > { %v1329_v46 = vpop.permute.xlu0 %1328  ;;  %v2011_v20 = vld [vmem:[#allocation3 + $0xc0] sm:$0xff] }
 0x283   : > { %1399 = vst.msk [vmem:[#allocation3 + $0xd0] sm:$0xff] %vm1372_vm6, %v1329_v46  ;;  %2851 = vmatprep.mubr.msk.f32.mxu1 %vm2024_vm10, %v2011_v20  ;;  %v1877_v49 = vpop.permute.xlu1 %1876 }
 0x284   : > { %1964 = vst.msk [vmem:[#allocation3 + $0x48] sm:$0xff] %vm1954_vm9, %v1877_v49 }
 0x286   : > { %v1909_v12 = vpop.permute.xlu0 %1908 }
 0x287   : > { %1980 = vst.msk [vmem:[#allocation3 + $0xc8] sm:$0xff] %vm1954_vm9, %v1909_v12  ;;  %v1299_v29 = vpop.permute.xlu1 %1298 }
 0x288   : > { %1384 = vst.msk [vmem:[#allocation3 + $0x58] sm:$0xff] %vm1372_vm6, %v1299_v29 }
 0x28a   : > { %v1331_v59 = vpop.permute.xlu0 %1330 }
 0x28b   : > { %1400 = vst.msk [vmem:[#allocation3 + $0xd8] sm:$0xff] %vm1372_vm6, %v1331_v59  ;;  %v1493_v51 = vpop.permute.xlu1 %1492  ;;  %v1996_v30 = vld [vmem:[#allocation3 + $0x48] sm:$0xff] }
 0x28c   : > { %1579 = vst.msk [vmem:[#allocation3 + $0x50] sm:$0xff] %vm1568_vm7, %v1493_v51  ;;  %2828 = vmatmul.mubr.msk.f32.gmra.mrb[8].mxu0 %vm2024_vm10, %v1996_v30 }
 0x28e   : > { %v1525_v60 = vpop.permute.xlu0 %1524  ;;  %v2012_v13 = vld [vmem:[#allocation3 + $0xc8] sm:$0xff] }
 0x28f   : > { %1595 = vst.msk [vmem:[#allocation3 + $0xd0] sm:$0xff] %vm1568_vm7, %v1525_v60  ;;  %2852 = vmatmul.mubr.msk.f32.gmra.mrb[8].mxu1 %vm2024_vm10, %v2012_v13  ;;  %v1495_v52 = vpop.permute.xlu1 %1494 }
 0x290   : > { %1580 = vst.msk [vmem:[#allocation3 + $0x58] sm:$0xff] %vm1568_vm7, %v1495_v52 }
 0x292   : > { %v1527_v58 = vpop.permute.xlu0 %1526 }
 0x293   : > { %1596 = vst.msk [vmem:[#allocation3 + $0xd8] sm:$0xff] %vm1568_vm7, %v1527_v58  ;;  %v1686_v24 = vpop.permute.xlu1 %1685 }
 0x294   : > { %1772 = vst.msk [vmem:[#allocation3 + $0x50] sm:$0xff] %vm1761_vm8, %v1686_v24 }
 0x296   : > { %v1718_v63 = vpop.permute.xlu0 %1717 }
 0x297   : > { %1788 = vst.msk [vmem:[#allocation3 + $0xd0] sm:$0xff] %vm1761_vm8, %v1718_v63  ;;  %v1108_v23 = vpop.permute.xlu1 %1107 }
 0x298   : > { %1192 = vst.msk [vmem:[#allocation3 + $0x60] sm:$0xff] %vm1179_vm5, %v1108_v23 }
 0x29a   : > { %v1140_v43 = vpop.permute.xlu0 %1139 }
 0x29b   : > { %1208 = vst.msk [vmem:[#allocation3 + $0xe0] sm:$0xff] %vm1179_vm5, %v1140_v43  ;;  %v1688_v10 = vpop.permute.xlu1 %1687 }
 0x29c   : > { %1773 = vst.msk [vmem:[#allocation3 + $0x58] sm:$0xff] %vm1761_vm8, %v1688_v10 }
 0x29e   : > { %v1720_v44 = vpop.permute.xlu0 %1719 }
 0x29f   : > { %1789 = vst.msk [vmem:[#allocation3 + $0xd8] sm:$0xff] %vm1761_vm8, %v1720_v44  ;;  %v1879_v50 = vpop.permute.xlu1 %1878 }
 0x2a0   : > { %1965 = vst.msk [vmem:[#allocation3 + $0x50] sm:$0xff] %vm1954_vm9, %v1879_v50 }
 0x2a2   : > { %v1911_v26 = vpop.permute.xlu0 %1910 }
 0x2a3   : > { %1981 = vst.msk [vmem:[#allocation3 + $0xd0] sm:$0xff] %vm1954_vm9, %v1911_v26  ;;  %v1110_v42 = vpop.permute.xlu1 %1109 }
 0x2a4   : > { %1193 = vst.msk [vmem:[#allocation3 + $0x68] sm:$0xff] %vm1179_vm5, %v1110_v42 }
 0x2a6   : > { %v1142_v54 = vpop.permute.xlu0 %1141 }
 0x2a7   : > { %1209 = vst.msk [vmem:[#allocation3 + $0xe8] sm:$0xff] %vm1179_vm5, %v1142_v54  ;;  %v1301_v9 = vpop.permute.xlu1 %1300  ;;  %v1997_v57 = vld [vmem:[#allocation3 + $0x50] sm:$0xff] }
 0x2a8   : > { %1385 = vst.msk [vmem:[#allocation3 + $0x60] sm:$0xff] %vm1372_vm6, %v1301_v9  ;;  %2830 = vmatprep.mubr.msk.f32.mxu0 %vm2024_vm10, %v1997_v57 }
 0x2aa   : > { %v1333_v3 = vpop.permute.xlu0 %1332  ;;  %v2013_v17 = vld [vmem:[#allocation3 + $0xd0] sm:$0xff] }
 0x2ab   : > { %1401 = vst.msk [vmem:[#allocation3 + $0xe0] sm:$0xff] %vm1372_vm6, %v1333_v3  ;;  %2854 = vmatprep.mubr.msk.f32.mxu1 %vm2024_vm10, %v2013_v17  ;;  %v1881_v53 = vpop.permute.xlu1 %1880 }
 0x2ac   : > { %1966 = vst.msk [vmem:[#allocation3 + $0x58] sm:$0xff] %vm1954_vm9, %v1881_v53 }
 0x2ae   : > { %v1913_v16 = vpop.permute.xlu0 %1912 }
 0x2af   : > { %1982 = vst.msk [vmem:[#allocation3 + $0xd8] sm:$0xff] %vm1954_vm9, %v1913_v16  ;;  %v1303_v45 = vpop.permute.xlu1 %1302 }
 0x2b0   : > { %1386 = vst.msk [vmem:[#allocation3 + $0x68] sm:$0xff] %vm1372_vm6, %v1303_v45 }
 0x2b2   : > { %v1335_v31 = vpop.permute.xlu0 %1334 }
 0x2b3   : > { %1402 = vst.msk [vmem:[#allocation3 + $0xe8] sm:$0xff] %vm1372_vm6, %v1335_v31  ;;  %v1497_v18 = vpop.permute.xlu1 %1496  ;;  %v1998_v19 = vld [vmem:[#allocation3 + $0x58] sm:$0xff] }
 0x2b4   : > { %1581 = vst.msk [vmem:[#allocation3 + $0x60] sm:$0xff] %vm1568_vm7, %v1497_v18  ;;  %2831 = vmatmul.mubr.msk.f32.gmra.mrb[10].mxu0 %vm2024_vm10, %v1998_v19 }
 0x2b6   : > { %v1529_v6 = vpop.permute.xlu0 %1528  ;;  %v2014_v15 = vld [vmem:[#allocation3 + $0xd8] sm:$0xff] }
 0x2b7   : > { %1597 = vst.msk [vmem:[#allocation3 + $0xe0] sm:$0xff] %vm1568_vm7, %v1529_v6  ;;  %2855 = vmatmul.mubr.msk.f32.gmra.mrb[10].mxu1 %vm2024_vm10, %v2014_v15  ;;  %v1499_v33 = vpop.permute.xlu1 %1498 }
 0x2b8   : > { %1582 = vst.msk [vmem:[#allocation3 + $0x68] sm:$0xff] %vm1568_vm7, %v1499_v33 }
 0x2ba   : > { %v1531_v55 = vpop.permute.xlu0 %1530 }
 0x2bb   : > { %1598 = vst.msk [vmem:[#allocation3 + $0xe8] sm:$0xff] %vm1568_vm7, %v1531_v55  ;;  %v1690_v34 = vpop.permute.xlu1 %1689 }
 0x2bc   : > { %1774 = vst.msk [vmem:[#allocation3 + $0x60] sm:$0xff] %vm1761_vm8, %v1690_v34 }
 0x2be   : > { %v1722_v1 = vpop.permute.xlu0 %1721 }
 0x2bf   : > { %1790 = vst.msk [vmem:[#allocation3 + $0xe0] sm:$0xff] %vm1761_vm8, %v1722_v1  ;;  %v1112_v56 = vpop.permute.xlu1 %1111  ;;  %v2817_v27 = vpop.f32.mrb[0].mxu0 }
 0x2c0   : > { %1194 = vst.msk [vmem:[#allocation3 + $0x70] sm:$0xff] %vm1179_vm5, %v1112_v56  ;;  %2351 = vst [vmem:[%s4384_s0 + $0x8] sm:$0xff] %v2817_v27  ;;  %v2191_v47 = vpop.f32.mrb[1].mxu0 }
 0x2c1   : > { %2350 = vst [vmem:[%s4384_s0] sm:$0xff] %v2191_v47 }
 0x2c2   : > { %v2841_v2 = vpop.f32.mrb[0].mxu1  ;;  %v1144_v28 = vpop.permute.xlu0 %1143 }
 0x2c3   : > { %2367 = vst [vmem:[%s4384_s0 + $0x88] sm:$0xff] %v2841_v2  ;;  %1210 = vst.msk [vmem:[#allocation3 + $0xf0] sm:$0xff] %vm1179_vm5, %v1144_v28  ;;  %v2271_v32 = vpop.f32.mrb[1].mxu1  ;;  %v1692_v48 = vpop.permute.xlu1 %1691 }
 0x2c4   : > { %2366 = vst [vmem:[%s4384_s0 + $0x80] sm:$0xff] %v2271_v32  ;;  %1775 = vst.msk [vmem:[#allocation3 + $0x68] sm:$0xff] %vm1761_vm8, %v1692_v48 }
 0x2c6   : > { %v1724_v21 = vpop.permute.xlu0 %1723 }
 0x2c7   : > { %1791 = vst.msk [vmem:[#allocation3 + $0xe8] sm:$0xff] %vm1761_vm8, %v1724_v21  ;;  %v1883_v14 = vpop.permute.xlu1 %1882 }
 0x2c8   : > { %1967 = vst.msk [vmem:[#allocation3 + $0x60] sm:$0xff] %vm1954_vm9, %v1883_v14 }
 0x2ca   : > { %v1915_v7 = vpop.permute.xlu0 %1914 }
 0x2cb   : > { %1983 = vst.msk [vmem:[#allocation3 + $0xe0] sm:$0xff] %vm1954_vm9, %v1915_v7  ;;  %v1114_v8 = vpop.permute.xlu1 %1113 }
 0x2cc   : > { %1195 = vst.msk [vmem:[#allocation3 + $0x78] sm:$0xff] %vm1179_vm5, %v1114_v8 }
 0x2ce   : > { %v1146_v11 = vpop.permute.xlu0 %1145 }
 0x2cf   : > { %1211 = vst.msk [vmem:[#allocation3 + $0xf8] sm:$0xff] %vm1179_vm5, %v1146_v11  ;;  %v1305_v35 = vpop.permute.xlu1 %1304  ;;  %v1999_v0 = vld [vmem:[#allocation3 + $0x60] sm:$0xff] }
 0x2d0   : > { %1387 = vst.msk [vmem:[#allocation3 + $0x70] sm:$0xff] %vm1372_vm6, %v1305_v35  ;;  %2833 = vmatprep.mubr.msk.f32.mxu0 %vm2024_vm10, %v1999_v0 }
 0x2d2   : > { %v1337_v36 = vpop.permute.xlu0 %1336  ;;  %v2015_v37 = vld [vmem:[#allocation3 + $0xe0] sm:$0xff] }
 0x2d3   : > { %1403 = vst.msk [vmem:[#allocation3 + $0xf0] sm:$0xff] %vm1372_vm6, %v1337_v36  ;;  %2857 = vmatprep.mubr.msk.f32.mxu1 %vm2024_vm10, %v2015_v37  ;;  %v1885_v38 = vpop.permute.xlu1 %1884 }
 0x2d4   : > { %1968 = vst.msk [vmem:[#allocation3 + $0x68] sm:$0xff] %vm1954_vm9, %v1885_v38 }
 0x2d6   : > { %v1917_v39 = vpop.permute.xlu0 %1916 }
 0x2d7   : > { %1984 = vst.msk [vmem:[#allocation3 + $0xe8] sm:$0xff] %vm1954_vm9, %v1917_v39  ;;  %v1307_v61 = vpop.permute.xlu1 %1306 }
 0x2d8   : > { %1388 = vst.msk [vmem:[#allocation3 + $0x78] sm:$0xff] %vm1372_vm6, %v1307_v61 }
 0x2da   : > { %v1339_v25 = vpop.permute.xlu0 %1338 }
 0x2db   : > { %1404 = vst.msk [vmem:[#allocation3 + $0xf8] sm:$0xff] %vm1372_vm6, %v1339_v25  ;;  %v1501_v62 = vpop.permute.xlu1 %1500  ;;  %v2000_v22 = vld [vmem:[#allocation3 + $0x68] sm:$0xff] }
 0x2dc   : > { %1583 = vst.msk [vmem:[#allocation3 + $0x70] sm:$0xff] %vm1568_vm7, %v1501_v62  ;;  %2834 = vmatmul.mubr.msk.f32.gmra.mrb[12].mxu0 %vm2024_vm10, %v2000_v22 }
 0x2de   : > { %v1533_v5 = vpop.permute.xlu0 %1532  ;;  %v2016_v40 = vld [vmem:[#allocation3 + $0xe8] sm:$0xff] }
 0x2df   : > { %1599 = vst.msk [vmem:[#allocation3 + $0xf0] sm:$0xff] %vm1568_vm7, %v1533_v5  ;;  %2858 = vmatmul.mubr.msk.f32.gmra.mrb[12].mxu1 %vm2024_vm10, %v2016_v40  ;;  %v1503_v4 = vpop.permute.xlu1 %1502 }
 0x2e0   : > { %1584 = vst.msk [vmem:[#allocation3 + $0x78] sm:$0xff] %vm1568_vm7, %v1503_v4 }
 0x2e2   : > { %v1535_v41 = vpop.permute.xlu0 %1534 }
 0x2e3   : > { %1600 = vst.msk [vmem:[#allocation3 + $0xf8] sm:$0xff] %vm1568_vm7, %v1535_v41  ;;  %v1694_v46 = vpop.permute.xlu1 %1693 }
 0x2e4   : > { %1776 = vst.msk [vmem:[#allocation3 + $0x70] sm:$0xff] %vm1761_vm8, %v1694_v46 }
 0x2e6   : > { %v1726_v20 = vpop.permute.xlu0 %1725 }
 0x2e7   : > { %1792 = vst.msk [vmem:[#allocation3 + $0xf0] sm:$0xff] %vm1761_vm8, %v1726_v20  ;;  %v1696_v49 = vpop.permute.xlu1 %1695  ;;  %v2820_v12 = vpop.f32.mrb[2].mxu0 }
 0x2e8   : > { %1777 = vst.msk [vmem:[#allocation3 + $0x78] sm:$0xff] %vm1761_vm8, %v1696_v49  ;;  %2353 = vst [vmem:[%s4384_s0 + $0x18] sm:$0xff] %v2820_v12  ;;  %v2201_v29 = vpop.f32.mrb[3].mxu0 }
 0x2e9   : > { %2352 = vst [vmem:[%s4384_s0 + $0x10] sm:$0xff] %v2201_v29 }
 0x2ea   : > { %v2844_v59 = vpop.f32.mrb[2].mxu1  ;;  %v1728_v51 = vpop.permute.xlu0 %1727 }
 0x2eb   : > { %2369 = vst [vmem:[%s4384_s0 + $0x98] sm:$0xff] %v2844_v59  ;;  %1793 = vst.msk [vmem:[#allocation3 + $0xf8] sm:$0xff] %vm1761_vm8, %v1728_v51  ;;  %v2281_v30 = vpop.f32.mrb[3].mxu1  ;;  %v1887_v60 = vpop.permute.xlu1 %1886 }
 0x2ec   : > { %2368 = vst [vmem:[%s4384_s0 + $0x90] sm:$0xff] %v2281_v30  ;;  %1969 = vst.msk [vmem:[#allocation3 + $0x70] sm:$0xff] %vm1954_vm9, %v1887_v60 }
 0x2ee   : > { %v1919_v13 = vpop.permute.xlu0 %1918 }
 0x2ef   : > { %1985 = vst.msk [vmem:[#allocation3 + $0xf0] sm:$0xff] %vm1954_vm9, %v1919_v13  ;;  %v1889_v52 = vpop.permute.xlu1 %1888 }
 0x2f0   : > { %1970 = vst.msk [vmem:[#allocation3 + $0x78] sm:$0xff] %vm1954_vm9, %v1889_v52 }
 0x2f2   : > { %v1921_v58 = vpop.permute.xlu0 %1920 }
 0x2f3   : > { %1986 = vst.msk [vmem:[#allocation3 + $0xf8] sm:$0xff] %vm1954_vm9, %v1921_v58  ;;  %v2001_v24 = vld [vmem:[#allocation3 + $0x70] sm:$0xff] }
 0x2f4   : > { %2836 = vmatprep.mubr.msk.f32.mxu0 %vm2024_vm10, %v2001_v24 }
 0x2f6   : > { %v2017_v63 = vld [vmem:[#allocation3 + $0xf0] sm:$0xff] }
 0x2f7   : > { %2860 = vmatprep.mubr.msk.f32.mxu1 %vm2024_vm10, %v2017_v63  ;;  %v2002_v23 = vld [vmem:[#allocation3 + $0x78] sm:$0xff] }
 0x2f8   : > { %2837 = vmatmul.mubr.msk.f32.gmra.mrb[14].mxu0 %vm2024_vm10, %v2002_v23 }
 0x2fa   : > { %v2018_v43 = vld [vmem:[#allocation3 + $0xf8] sm:$0xff] }
 0x2fb   : > { %2861 = vmatmul.mubr.msk.f32.gmra.mrb[14].mxu1 %vm2024_vm10, %v2018_v43 }
 0x30f   : > { %v2823_v10 = vpop.f32.mrb[4].mxu0 }
 0x310   : > { %2355 = vst [vmem:[%s4384_s0 + $0x28] sm:$0xff] %v2823_v10  ;;  %v2211_v44 = vpop.f32.mrb[5].mxu0 }
 0x311   : > { %2354 = vst [vmem:[%s4384_s0 + $0x20] sm:$0xff] %v2211_v44 }
 0x312   : > { %v2847_v50 = vpop.f32.mrb[4].mxu1 }
 0x313   : > { %2371 = vst [vmem:[%s4384_s0 + $0xa8] sm:$0xff] %v2847_v50  ;;  %v2291_v26 = vpop.f32.mrb[5].mxu1 }
 0x314   : > { %2370 = vst [vmem:[%s4384_s0 + $0xa0] sm:$0xff] %v2291_v26 }
 0x337   : > { %v2826_v42 = vpop.f32.mrb[6].mxu0 }
 0x338   : > { %2357 = vst [vmem:[%s4384_s0 + $0x38] sm:$0xff] %v2826_v42  ;;  %v2221_v54 = vpop.f32.mrb[7].mxu0 }
 0x339   : > { %2356 = vst [vmem:[%s4384_s0 + $0x30] sm:$0xff] %v2221_v54 }
 0x33a   : > { %v2850_v9 = vpop.f32.mrb[6].mxu1 }
 0x33b   : > { %2373 = vst [vmem:[%s4384_s0 + $0xb8] sm:$0xff] %v2850_v9  ;;  %v2301_v57 = vpop.f32.mrb[7].mxu1 }
 0x33c   : > { %2372 = vst [vmem:[%s4384_s0 + $0xb0] sm:$0xff] %v2301_v57 }
 0x35f   : > { %v2829_v3 = vpop.f32.mrb[8].mxu0 }
 0x360   : > { %2359 = vst [vmem:[%s4384_s0 + $0x48] sm:$0xff] %v2829_v3  ;;  %v2231_v17 = vpop.f32.mrb[9].mxu0 }
 0x361   : > { %2358 = vst [vmem:[%s4384_s0 + $0x40] sm:$0xff] %v2231_v17 }
 0x362   : > { %v2853_v53 = vpop.f32.mrb[8].mxu1 }
 0x363   : > { %2375 = vst [vmem:[%s4384_s0 + $0xc8] sm:$0xff] %v2853_v53  ;;  %v2311_v16 = vpop.f32.mrb[9].mxu1 }
 0x364   : > { %2374 = vst [vmem:[%s4384_s0 + $0xc0] sm:$0xff] %v2311_v16 }
 0x387   : > { %v2832_v45 = vpop.f32.mrb[10].mxu0 }
 0x388   : > { %2361 = vst [vmem:[%s4384_s0 + $0x58] sm:$0xff] %v2832_v45  ;;  %v2241_v31 = vpop.f32.mrb[11].mxu0 }
 0x389   : > { %2360 = vst [vmem:[%s4384_s0 + $0x50] sm:$0xff] %v2241_v31 }
 0x38a   : > { %v2856_v18 = vpop.f32.mrb[10].mxu1 }
 0x38b   : > { %2377 = vst [vmem:[%s4384_s0 + $0xd8] sm:$0xff] %v2856_v18  ;;  %v2321_v19 = vpop.f32.mrb[11].mxu1 }
 0x38c   : > { %2376 = vst [vmem:[%s4384_s0 + $0xd0] sm:$0xff] %v2321_v19 }
 0x3af   : > { %v2835_v6 = vpop.f32.mrb[12].mxu0 }
 0x3b0   : > { %2363 = vst [vmem:[%s4384_s0 + $0x68] sm:$0xff] %v2835_v6  ;;  %v2251_v15 = vpop.f32.mrb[13].mxu0 }
 0x3b1   : > { %2362 = vst [vmem:[%s4384_s0 + $0x60] sm:$0xff] %v2251_v15 }
 0x3b2   : > { %v2859_v33 = vpop.f32.mrb[12].mxu1 }
 0x3b3   : > { %2379 = vst [vmem:[%s4384_s0 + $0xe8] sm:$0xff] %v2859_v33  ;;  %v2331_v55 = vpop.f32.mrb[13].mxu1 }
 0x3b4   : > { %2378 = vst [vmem:[%s4384_s0 + $0xe0] sm:$0xff] %v2331_v55 }
 0x3cb   : > { %v2838_v34 = vpop.f32.mrb[14].mxu0 }
 0x3cc   : > { %2365 = vst [vmem:[%s4384_s0 + $0x78] sm:$0xff] %v2838_v34  ;;  %v2261_v1 = vpop.f32.mrb[15].mxu0 }
 0x3cd   : > { %2364 = vst [vmem:[%s4384_s0 + $0x70] sm:$0xff] %v2261_v1 }
 0x3ce   : > { %v2862_v56 = vpop.f32.mrb[14].mxu1 }
 0x3cf   : > { %2381 = vst [vmem:[%s4384_s0 + $0xf8] sm:$0xff] %v2862_v56  ;;  %v2341_v27 = vpop.f32.mrb[15].mxu1 }
 0x3d0   : > { %2380 = vst [vmem:[%s4384_s0 + $0xf0] sm:$0xff] %v2341_v27 }
 0x3d1   : > { %3074 = shalt.err (!%p3071_p5)
}
 0x3d2   : > { %s3075_s21 = scalar_lea.hbm %s4454_s22, 4096  ;;  %s3079_s19 = scalar_lea.hbm %s4511_s3, 8192 }
 0x3d3   : > { %p3076_p12 = scmp.ne.s32.totalorder %s4454_s22, %s3075_s21  ;;  %p3080_p11 = scmp.lt.u32.totalorder %s4454_s22, %s4511_s3 }
 0x3d4   : > { %p3081_p6 = scmp.lt.u32.totalorder %s3079_s19, %s3075_s21  ;;  %p3083_p8 = scmp.lt.u32.totalorder %s3075_s21, %s4454_s22 }
 0x3d5   : > { %p3077_p10 = pnand %p3076_p12, %p4557_p13 }
 0x3d6   : > { %p3082_p1 = por %p3081_p6, %p3080_p11 }
 0x3d7   : > { %p3078_p9 = pneg %p3077_p10 }
 0x3d8   : > { %p3084_p4 = por %p3083_p8, %p3082_p1 }
 0x3da   : > { %p3085_p7 = pnand %p3084_p4, %p3078_p9 }
 0x3dc   : > { %3088 = shalt.err (!%p3085_p7)
}
 0x3dd   : > { %s3169_s30 = smov 128  }
 0x3de   : > { %2888 = dma.vmem_to_hbm [thread:$0]  (%p4557_p13), %s4456_s6, 4096, %s4454_s22, %s2383_s15, %s3169_s30, %s3169_s30, %s3161_s27  }
 0x3df PF: > { %s2415_s0 = sand.u32 1, %s3131_s12   ;;  %p4558_p0 = scmp.ne.s32.totalorder %s4535_s4, 0 }
 0x3e0   : > { %p4559_p3 = scmp.ge.s32.totalorder %s3151_s17, 2  ;;  %s2416_s2 = scalar_lea.sflag [#allocation6], %s2415_s0 }
 0x3e2   : > { %p2902_p2 = pnand %p4559_p3, %p4558_p0 }
 0x3e4   : > { %3126 = dma.done.wait (!%p2902_p2), %s2416_s2, 4096  }
 0x3e5   : > { %3128 = vsyncadd (!%p2902_p2), %s2416_s2, 4294963200  ;;  %s20_s17 = sadd.s32 1, %s3151_s17   ;;  %s4560_s12 = smov %s3135_s13 }
 0x3e6   : > { %p17_p5 = scmp.ge.s32.totalorder %s20_s17, 4   ;;  %s4561_s13 = smov %s3139_s14 }
 0x3e7   : > { %s4562_s14 = smov %s3238_s24  ;;  %s4563_s15 = smov %s3147_s16 }
 0x3e8   : > { %s4564_s16 = smov %s4566_s18  ;;  %19 = sbr.rel (!%p17_p5) target bundleno = 10 (0xa), region = 100 }
 0x3ef   :  { %2421 = vsyncpa [#allocation5], 1 }
 0x3f0   :  { %2423 = vsyncpa [#allocation5 + $0x1], 1 }
 0x3f1   :  { %2424 = vsyncpa [#allocation8], 1 }
 0x3f2   :  { %2425 = vsyncpa [#allocation6], 1 }
 0x3f3   :  { %2427 = vsyncpa [#allocation6 + $0x1], 1 }

</bundles_post_ra>
